<compile_context>
chip_gen: v7x
topology: tpu7x:2x2x1
jax: 0.10.0
libtpu: 0.0.40
codegen_flags: <defaults>
</compile_context>

<pallas_src>
import functools
import math

import jax
import jax.numpy as jnp
from jax import lax
from jax.experimental import pallas as pl
from jax.experimental.pallas import tpu as pltpu

EPS = 1e-5                       # torch.nn.LayerNorm default eps
NEG_INF = -1e30                  # finite "-inf" for masking / running-max init
_VMEM_LIMIT = 32 * 1024 * 1024   # explicit scoped-VMEM budget (safe on v5e/v6e/v7x)


# ---------------------------------------------------------------------------
# In-kernel helpers
# ---------------------------------------------------------------------------
def _layernorm(x, g, b):
    """LayerNorm over the last dim; rsqrt (EUP slot) instead of divide."""
    mu = jnp.mean(x, axis=-1, keepdims=True)
    xc = x - mu
    var = jnp.mean(xc * xc, axis=-1, keepdims=True)
    return xc * lax.rsqrt(var + EPS) * g + b


def _erf(x):
    # Abramowitz & Stegun 7.1.26 (|err| < 1.5e-7). Uses only abs/exp/mul/add,
    # so it lowers cleanly in Mosaic without relying on an erf lowering rule.
    a1, a2, a3, a4, a5 = (0.254829592, -0.284496736, 1.421413741,
                          -1.453152027, 1.061405429)
    p = 0.3275911
    ax = jnp.abs(x)
    t = 1.0 / (1.0 + p * ax)
    poly = t * (a1 + t * (a2 + t * (a3 + t * (a4 + t * a5))))
    y = 1.0 - poly * jnp.exp(-ax * ax)
    return jnp.where(x >= 0, y, -y)


def _gelu_exact(x):
    # torch.nn.GELU() default: 0.5 * x * (1 + erf(x / sqrt(2)))
    return 0.5 * x * (1.0 + _erf(x * (1.0 / math.sqrt(2.0))))


def _bf16(x):
    return x.astype(jnp.bfloat16)


# ---------------------------------------------------------------------------
# Kernel 1: one full decoder layer (pre-norm MHA + pre-norm MLP, both residual)
#   grid = (batch, q-row-block, kv-block); kv-block is the reduction axis.
# ---------------------------------------------------------------------------
def decoder_layer_kernel(xq_ref, xkv_ref,
                         ln1_g_ref, ln1_b_ref,
                         wq_ref, bq_ref, wkv_ref, bkv_ref, wp_ref, bp_ref,
                         ln2_g_ref, ln2_b_ref,
                         w1_ref, b1_ref, w2_ref, b2_ref,
                         o_ref,
                         q_sc, m_sc, l_sc, acc_sc,
                         *, num_heads, datt, dmid, tq, tk):
    qi = pl.program_id(1)            # query-row block index
    ki = pl.program_id(2)            # key/value block index (reduction)

    # ---- init once per (batch, q-block): cache scaled Q, reset softmax state
    @pl.when(ki == 0)
    def _init():
        xn_q = _layernorm(xq_ref[0], ln1_g_ref[...], ln1_b_ref[...])
        q = jnp.dot(_bf16(xn_q), wq_ref[...],
                    preferred_element_type=jnp.float32) + bq_ref[...]
        # fold 1/sqrt(Datt) into Q (T*Datt work instead of T*T per head)
        q_sc[...] = _bf16(q * (1.0 / math.sqrt(datt)))
        m_sc[...] = jnp.full(m_sc.shape, NEG_INF, jnp.float32)
        l_sc[...] = jnp.zeros(l_sc.shape, jnp.float32)
        acc_sc[...] = jnp.zeros(acc_sc.shape, jnp.float32)

    # ---- online-softmax step; fully-masked kv blocks (ki > qi) are skipped
    @pl.when(ki <= qi)
    def _online():
        xn_kv = _layernorm(xkv_ref[0], ln1_g_ref[...], ln1_b_ref[...])
        kv = jnp.dot(_bf16(xn_kv), wkv_ref[...],
                     preferred_element_type=jnp.float32) + bkv_ref[...]
        k_all = kv[:, :num_heads * datt]
        v_all = kv[:, num_heads * datt:]
        q_all = q_sc[...]                                   # (tq, H*datt) bf16

        # additive causal-mask bias for this (q-block, kv-block) tile;
        # below-diagonal tiles get an all-zero bias (cheap VPU add).
        qpos = qi * tq + lax.broadcasted_iota(jnp.int32, (tq, tk), 0)
        kpos = ki * tk + lax.broadcasted_iota(jnp.int32, (tq, tk), 1)
        bias = jnp.where(kpos <= qpos, 0.0, NEG_INF).astype(jnp.float32)

        for h in range(num_heads):                          # static unroll
            q_h = q_all[:, h * datt:(h + 1) * datt]
            k_h = _bf16(k_all[:, h * datt:(h + 1) * datt])
            v_h = _bf16(v_all[:, h * dmid:(h + 1) * dmid])
            s = lax.dot_general(q_h, k_h, (((1,), (1,)), ((), ())),
                                preferred_element_type=jnp.float32) + bias
            m_old = m_sc[h]
            m_new = jnp.maximum(m_old, jnp.max(s, axis=-1, keepdims=True))
            alpha = jnp.exp(m_old - m_new)
            p = jnp.exp(s - m_new)
            l_sc[h] = alpha * l_sc[h] + jnp.sum(p, axis=-1, keepdims=True)
            acc_sc[h] = alpha * acc_sc[h] + jnp.dot(
                _bf16(p), v_h, preferred_element_type=jnp.float32)
            m_sc[h] = m_new

    # ---- finalize at the diagonal block: proj + residual, then the MLP block
    @pl.when(ki == qi)
    def _finalize():
        x_q = xq_ref[0]
        d_out = wp_ref.shape[1]
        y_att = jnp.zeros((tq, d_out), jnp.float32)
        for h in range(num_heads):      # fold output projection per head
            o_h = acc_sc[h] * pl.reciprocal(l_sc[h], approx=True)
            y_att = y_att + jnp.dot(_bf16(o_h),
                                    wp_ref[h * dmid:(h + 1) * dmid, :],
                                    preferred_element_type=jnp.float32)
        x1 = x_q + y_att + bp_ref[...]                      # residual 1

        xn2 = _layernorm(x1, ln2_g_ref[...], ln2_b_ref[...])
        hid = jnp.dot(_bf16(xn2), w1_ref[...],
                      preferred_element_type=jnp.float32) + b1_ref[...]
        hid = _gelu_exact(hid)
        y_mlp = jnp.dot(_bf16(hid), w2_ref[...],
                        preferred_element_type=jnp.float32) + b2_ref[...]
        o_ref[0] = x1 + y_mlp                               # residual 2


# ---------------------------------------------------------------------------
# Kernel 2: final LayerNorm + vocab-tiled projection with online log-sum-exp
# ---------------------------------------------------------------------------
def final_logits_kernel(x_ref, ln_g_ref, ln_b_ref, wout_ref,
                        logits_ref, lse_ref,
                        xn_sc, m_sc, l_sc):
    vi = pl.program_id(2)

    @pl.when(vi == 0)
    def _init():
        xn = _layernorm(x_ref[0], ln_g_ref[...], ln_b_ref[...])
        xn_sc[...] = _bf16(xn)                              # cache LN once
        m_sc[...] = jnp.full(m_sc.shape, NEG_INF, jnp.float32)
        l_sc[...] = jnp.zeros(l_sc.shape, jnp.float32)

    logits = jnp.dot(xn_sc[...], wout_ref[...],
                     preferred_element_type=jnp.float32)     # (tr, tv)
    logits_ref[0] = logits

    m_old = m_sc[...]
    m_new = jnp.maximum(m_old, jnp.max(logits, axis=-1, keepdims=True))
    l_sc[...] = (jnp.exp(m_old - m_new) * l_sc[...]
                 + jnp.sum(jnp.exp(logits - m_new), axis=-1, keepdims=True))
    m_sc[...] = m_new

    @pl.when(vi == pl.num_programs(2) - 1)
    def _fin():
        lse_ref[0] = m_sc[...] + jnp.log(l_sc[...])


# ---------------------------------------------------------------------------
# Kernel 3: log-softmax finalization  y = logits - lse  (aliases the logits buf)
# ---------------------------------------------------------------------------
def log_softmax_apply_kernel(logits_ref, lse_ref, o_ref):
    o_ref[0] = logits_ref[0] - lse_ref[0]


# ---------------------------------------------------------------------------
# pallas_call wrappers
# ---------------------------------------------------------------------------
def _const_spec(shape):
    nd = len(shape)
    return pl.BlockSpec(shape, lambda *_, _nd=nd: (0,) * _nd)


def _pick_block(n, target, align):
    """Largest divisor of n that is <= target and a multiple of `align`;
    falls back to the full dimension n (always legal as a block size)."""
    hi = min(n, target)
    hi -= hi % align
    for c in range(hi, 0, -align):
        if n % c == 0:
            return c
    return n


def decoder_layer(x, p, *, num_heads, datt, dmid):
    N, T, D = x.shape
    tq = _pick_block(T, 128, 8)
    tk = tq
    grid = (N, T // tq, T // tk)      # (parallel, parallel, arbitrary)

    weights = (p["ln1_g"], p["ln1_b"],
               p["w_q"], p["b_q"], p["w_kv"], p["b_kv"], p["wp"], p["bp"],
               p["ln2_g"], p["ln2_b"],
               p["w1"], p["b1"], p["w2"], p["b2"])

    kernel = functools.partial(decoder_layer_kernel, num_heads=num_heads,
                               datt=datt, dmid=dmid, tq=tq, tk=tk)
    # TODO(synk): for very large D/Dh on v7x (64 MiB VMEM), move the big weights
    # to memory_space=pl.ANY with a single manual DMA and tile Dh.
    return pl.pallas_call(
        kernel,
        out_shape=jax.ShapeDtypeStruct((N, T, D), jnp.float32),
        grid=grid,
        in_specs=[pl.BlockSpec((1, tq, D), lambda b, q, k: (b, q, 0)),   # q rows
                  pl.BlockSpec((1, tk, D), lambda b, q, k: (b, k, 0))]   # kv rows
                 + [_const_spec(w.shape) for w in weights],
        out_specs=pl.BlockSpec((1, tq, D), lambda b, q, k: (b, q, 0)),
        scratch_shapes=[
            pltpu.VMEM((tq, num_heads * datt), jnp.bfloat16),   # scaled Q cache
            pltpu.VMEM((num_heads, tq, 1), jnp.float32),        # running max
            pltpu.VMEM((num_heads, tq, 1), jnp.float32),        # running denom
            pltpu.VMEM((num_heads, tq, dmid), jnp.float32),     # unnormalized acc
        ],
        compiler_params=pltpu.CompilerParams(
            dimension_semantics=("parallel", "parallel", "arbitrary"),
            vmem_limit_bytes=_VMEM_LIMIT),
    )(x, x, *weights)


def final_logits(x, p):
    N, T, D = x.shape
    V = p["w_out"].shape[1]
    tr = _pick_block(T, 256, 8)
    tv = _pick_block(V, 512, 128)
    grid = (N, T // tr, V // tv)
    return pl.pallas_call(
        final_logits_kernel,
        out_shape=(jax.ShapeDtypeStruct((N, T, V), jnp.float32),
                   jax.ShapeDtypeStruct((N, T, 1), jnp.float32)),
        grid=grid,
        in_specs=[pl.BlockSpec((1, tr, D), lambda b, r, v: (b, r, 0)),
                  _const_spec(p["ln_g"].shape),
                  _const_spec(p["ln_b"].shape),
                  pl.BlockSpec((D, tv), lambda b, r, v: (0, v))],
        out_specs=(pl.BlockSpec((1, tr, tv), lambda b, r, v: (b, r, v)),
                   pl.BlockSpec((1, tr, 1), lambda b, r, v: (b, r, 0))),
        scratch_shapes=[pltpu.VMEM((tr, D), jnp.bfloat16),      # cached LN(x)
                        pltpu.VMEM((tr, 1), jnp.float32),       # running max
                        pltpu.VMEM((tr, 1), jnp.float32)],      # running sum
        compiler_params=pltpu.CompilerParams(
            dimension_semantics=("parallel", "parallel", "arbitrary"),
            vmem_limit_bytes=_VMEM_LIMIT),
    )(x, p["ln_g"], p["ln_b"], p["w_out"])


def log_softmax_apply(logits, lse):
    N, T, V = logits.shape
    tr = _pick_block(T, 256, 8)
    tv = _pick_block(V, 512, 128)
    grid = (N, T // tr, V // tv)
    return pl.pallas_call(
        log_softmax_apply_kernel,
        out_shape=jax.ShapeDtypeStruct((N, T, V), jnp.float32),
        grid=grid,
        in_specs=[pl.BlockSpec((1, tr, tv), lambda b, r, v: (b, r, v)),
                  pl.BlockSpec((1, tr, 1), lambda b, r, v: (b, r, 0))],
        out_specs=pl.BlockSpec((1, tr, tv), lambda b, r, v: (b, r, v)),
        input_output_aliases={0: 0},          # reuse the logits HBM buffer
        compiler_params=pltpu.CompilerParams(
            dimension_semantics=("parallel", "parallel", "parallel"),
            vmem_limit_bytes=_VMEM_LIMIT),
    )(logits, lse)


# ---------------------------------------------------------------------------
# Parameters (deterministic, synthetic). Matmul weights stored bf16; biases,
# LayerNorm params and embeddings stay f32.
# ---------------------------------------------------------------------------
def sinusoidal_pos_emb(T, D):
    num = jnp.arange(T, dtype=jnp.float32)[:, None]
    denom = jnp.power(10000.0,
                      2.0 * jnp.arange(D // 2, dtype=jnp.float32) / D)[None, :]
    return jnp.stack([jnp.sin(num / denom), jnp.cos(num / denom)],
                     axis=-1).reshape(T, D)


def init_params(key, *, T, vocab_size, embed_dim, mlp_hidden_dim,
                num_layers, num_heads):
    D, H, Dh, V = embed_dim, num_heads, mlp_hidden_dim, vocab_size
    datt = dmid = D                       # module: Datt = Dmid = embed_dim
    counter = [0]

    def nk():                             # never runs out of keys
        counter[0] += 1
        return jax.random.fold_in(key, counter[0])

    def wf32(shape, scale=0.05):
        return scale * jax.random.normal(nk(), shape, dtype=jnp.float32)

    def wbf16(shape, scale=0.05):
        return wf32(shape, scale).astype(jnp.bfloat16)

    params = {
        "tok_emb": jax.random.normal(nk(), (V, D), dtype=jnp.float32),
        "pos_emb": sinusoidal_pos_emb(T, D),
        "layers": [],
        "final": {
            "ln_g": jnp.ones((1, D), jnp.float32),
            "ln_b": jnp.zeros((1, D), jnp.float32),
            "w_out": wbf16((D, V)),
        },
    }
    for _ in range(num_layers):
        params["layers"].append({
            "ln1_g": jnp.ones((1, D), jnp.float32),
            "ln1_b": jnp.zeros((1, D), jnp.float32),
            # fused all-head projections: columns [K heads | V heads]
            "w_q": wbf16((D, H * datt)),
            "b_q": wf32((1, H * datt), 0.02),
            "w_kv": wbf16((D, H * (datt + dmid))),
            "b_kv": wf32((1, H * (datt + dmid)), 0.02),
            "wp": wbf16((H * dmid, D)),
            "bp": wf32((1, D), 0.02),
            "ln2_g": jnp.ones((1, D), jnp.float32),
            "ln2_b": jnp.zeros((1, D), jnp.float32),
            "w1": wbf16((D, Dh)), "b1": wf32((1, Dh), 0.02),
            "w2": wbf16((Dh, D)), "b2": wf32((1, D), 0.02),
        })
    return params


# ---------------------------------------------------------------------------
# Full forward pass (Pallas hot path, JAX glue for the embedding gather)
# ---------------------------------------------------------------------------
def decoder_forward(ids, params, *, num_heads, datt, dmid):
    x = params["tok_emb"][ids] + params["pos_emb"][None, :, :]   # (N, T, D) glue
    for layer in params["layers"]:
        x = decoder_layer(x, layer, num_heads=num_heads, datt=datt, dmid=dmid)
    logits, lse = final_logits(x, params["final"])
    return log_softmax_apply(logits, lse)


# ---------------------------------------------------------------------------
# Pure-JAX f32 reference (mirrors the PyTorch module) for correctness check
# ---------------------------------------------------------------------------
def ref_forward(ids, params, *, num_heads, datt, dmid):
    def ln(x, g, b):
        mu = x.mean(-1, keepdims=True)
        var = ((x - mu) ** 2).mean(-1, keepdims=True)
        return (x - mu) / jnp.sqrt(var + EPS) * g + b

    H = num_heads
    T = params["pos_emb"].shape[0]
    mask = jnp.tril(jnp.ones((T, T), dtype=bool))
    x = params["tok_emb"][ids] + params["pos_emb"][None]
    for p in params["layers"]:
        xn = ln(x, p["ln1_g"], p["ln1_b"])
        q_all = xn @ p["w_q"].astype(jnp.float32) + p["b_q"]
        kv_all = xn @ p["w_kv"].astype(jnp.float32) + p["b_kv"]
        k_all = kv_all[..., :H * datt]
        v_all = kv_all[..., H * datt:]
        heads = []
        for h in range(H):
            q = q_all[..., h * datt:(h + 1) * datt]
            k = k_all[..., h * datt:(h + 1) * datt]
            v = v_all[..., h * dmid:(h + 1) * dmid]
            s = jnp.einsum("bxd,bzd->bxz", q, k)
            s = jnp.where(mask[None], s, -jnp.inf) / jnp.sqrt(datt)
            a = jax.nn.softmax(s, axis=-1)
            heads.append(jnp.einsum("bxz,bzd->bxd", a, v))
        x = x + jnp.concatenate(heads, -1) @ p["wp"].astype(jnp.float32) + p["bp"]
        xn = ln(x, p["ln2_g"], p["ln2_b"])
        hid = xn @ p["w1"].astype(jnp.float32) + p["b1"]
        hid = jax.nn.gelu(hid, approximate=False)
        x = x + hid @ p["w2"].astype(jnp.float32) + p["b2"]
    pf = params["final"]
    logits = ln(x, pf["ln_g"], pf["ln_b"]) @ pf["w_out"].astype(jnp.float32)
    return jax.nn.log_softmax(logits, axis=-1)


if __name__ == "__main__":
    N, T = 2, 8
    vocab_size, embed_dim, mlp_hidden_dim = 16, 32, 64
    num_layers, num_heads = 3, 2

    key = jax.random.PRNGKey(0)
    k_ids, k_params = jax.random.split(key)
    ids = jax.random.randint(k_ids, (N, T), 0, vocab_size, dtype=jnp.int32)
    params = init_params(k_params, T=T, vocab_size=vocab_size,
                         embed_dim=embed_dim, mlp_hidden_dim=mlp_hidden_dim,
                         num_layers=num_layers, num_heads=num_heads)

    fwd = jax.jit(functools.partial(decoder_forward, num_heads=num_heads,
                                    datt=embed_dim, dmid=embed_dim))
    y = jax.block_until_ready(fwd(ids, params))

    y_ref = ref_forward(ids, params, num_heads=num_heads,
                        datt=embed_dim, dmid=embed_dim)
    assert y.shape == (N, T, vocab_size)
    # bf16 MXU inputs (f32 accumulation) + approx reciprocal in the softmax
    # normalization => slightly looser tolerance than a pure-f32 comparison.
    err = float(jnp.max(jnp.abs(y - y_ref)))
    assert err < 3e-2, f"mismatch vs reference: {err}"
    # log-probs must normalize exactly (online LSE is exact)
    norm_err = float(jnp.max(jnp.abs(jnp.sum(jnp.exp(y), axis=-1) - 1.0)))
    assert norm_err < 1e-3, f"log-softmax not normalized: {norm_err}"

    print("KERNEL_OK")
</pallas_src>

<mosaic_0001>
module attributes {stable_mosaic.version = 11 : i64} {
  func.func @log_softmax_apply_kernel(%arg0: i32, %arg1: i32, %arg2: i32, %arg3: memref<1x8x16xf32, #tpu.memory_space<vmem>>, %arg4: memref<1x8x1xf32, #tpu.memory_space<vmem>>, %arg5: memref<1x8x16xf32, #tpu.memory_space<vmem>>) attributes {dimension_semantics = [#tpu.dimension_semantics<parallel>, #tpu.dimension_semantics<parallel>, #tpu.dimension_semantics<parallel>], iteration_bounds = array<i64: 2, 1, 1>, scalar_prefetch = 0 : i64, scratch_operands = 0 : i64, tpu.core_type = #tpu.core_type<tc>, window_params = [{transform_indices = @transform_0, window_bounds = array<i64: 1, 8, 16>}, {transform_indices = @transform_1, window_bounds = array<i64: 1, 8, 1>}, {transform_indices = @transform_2, window_bounds = array<i64: 1, 8, 16>}]} {
    %c0 = arith.constant 0 : index
    %c0_0 = arith.constant 0 : index
    %c0_1 = arith.constant 0 : index
    %0 = vector.load %arg3[%c0, %c0_0, %c0_1] : memref<1x8x16xf32, #tpu.memory_space<vmem>>, vector<1x8x16xf32>
    %1 = vector.shape_cast %0 : vector<1x8x16xf32> to vector<8x16xf32>
    %c0_2 = arith.constant 0 : index
    %c0_3 = arith.constant 0 : index
    %c0_4 = arith.constant 0 : index
    %2 = vector.load %arg4[%c0_2, %c0_3, %c0_4] : memref<1x8x1xf32, #tpu.memory_space<vmem>>, vector<1x8x1xf32>
    %3 = vector.shape_cast %2 : vector<1x8x1xf32> to vector<8x1xf32>
    %4 = vector.broadcast %3 : vector<8x1xf32> to vector<8x16xf32>
    %5 = arith.subf %1, %4 : vector<8x16xf32>
    %c0_5 = arith.constant 0 : index
    %c0_6 = arith.constant 0 : index
    %c0_7 = arith.constant 0 : index
    %6 = vector.load %arg5[%c0_5, %c0_6, %c0_7] : memref<1x8x16xf32, #tpu.memory_space<vmem>>, vector<1x8x16xf32>
    %7 = vector.shape_cast %6 : vector<1x8x16xf32> to vector<8x16xf32>
    %8 = vector.shape_cast %5 : vector<8x16xf32> to vector<1x8x16xf32>
    tpu.vector_store %arg5[%c0_5, %c0_6, %c0_7], %8 {strides = array<i32>} : memref<1x8x16xf32, #tpu.memory_space<vmem>>, vector<1x8x16xf32>,
    return
  }
  func.func @transform_0(%arg0: i32, %arg1: i32, %arg2: i32) -> (i32, i32, i32) {
    %c0_i32 = arith.constant 0 : i32
    return %arg0, %arg1, %arg2 : i32, i32, i32
  }
  func.func @transform_1(%arg0: i32, %arg1: i32, %arg2: i32) -> (i32, i32, i32) {
    %c0_i32 = arith.constant 0 : i32
    %c0_i32_0 = arith.constant 0 : i32
    return %arg0, %arg1, %c0_i32 : i32, i32, i32
  }
  func.func @transform_2(%arg0: i32, %arg1: i32, %arg2: i32) -> (i32, i32, i32) {
    %c0_i32 = arith.constant 0 : i32
    return %arg0, %arg1, %arg2 : i32, i32, i32
  }
}

module attributes {stable_mosaic.version = 11 : i64} {
  func.func @final_logits_kernel(%arg0: i32, %arg1: i32, %arg2: i32, %arg3: memref<1x8x32xf32, #tpu.memory_space<vmem>>, %arg4: memref<1x32xf32, #tpu.memory_space<vmem>>, %arg5: memref<1x32xf32, #tpu.memory_space<vmem>>, %arg6: memref<32x16xbf16, #tpu.memory_space<vmem>>, %arg7: memref<1x8x16xf32, #tpu.memory_space<vmem>>, %arg8: memref<1x8x1xf32, #tpu.memory_space<vmem>>, %arg9: memref<8x32xbf16, #tpu.memory_space<vmem>>, %arg10: memref<8x1xf32, #tpu.memory_space<vmem>>, %arg11: memref<8x1xf32, #tpu.memory_space<vmem>>) attributes {dimension_semantics = [#tpu.dimension_semantics<parallel>, #tpu.dimension_semantics<parallel>, #tpu.dimension_semantics<arbitrary>], iteration_bounds = array<i64: 2, 1, 1>, scalar_prefetch = 0 : i64, scratch_operands = 3 : i64, tpu.core_type = #tpu.core_type<tc>, window_params = [{transform_indices = @transform_0, window_bounds = array<i64: 1, 8, 32>}, {pipeline_mode = #tpu.pipeline_mode<synchronous>, transform_indices = @transform_1, window_bounds = array<i64: 1, 32>}, {pipeline_mode = #tpu.pipeline_mode<synchronous>, transform_indices = @transform_2, window_bounds = array<i64: 1, 32>}, {transform_indices = @transform_3, window_bounds = array<i64: 32, 16>}, {transform_indices = @transform_4, window_bounds = array<i64: 1, 8, 16>}, {transform_indices = @transform_5, window_bounds = array<i64: 1, 8, 1>}]} {
    %c0_i32 = arith.constant 0 : i32
    %0 = arith.cmpi eq, %arg2, %c0_i32 : i32
    %1 = arith.extui %0 : i1 to i32
    %c0_i32_0 = arith.constant 0 : i32
    %2 = arith.cmpi ne, %1, %c0_i32_0 : i32
    scf.if %2 {
      %c0_19 = arith.constant 0 : index
      %c0_20 = arith.constant 0 : index
      %c0_21 = arith.constant 0 : index
      %28 = vector.load %arg3[%c0_19, %c0_20, %c0_21] : memref<1x8x32xf32, #tpu.memory_space<vmem>>, vector<1x8x32xf32>
      %29 = vector.shape_cast %28 : vector<1x8x32xf32> to vector<8x32xf32>
      %c0_22 = arith.constant 0 : index
      %c0_23 = arith.constant 0 : index
      %30 = vector.load %arg4[%c0_22, %c0_23] : memref<1x32xf32, #tpu.memory_space<vmem>>, vector<1x32xf32>
      %c0_24 = arith.constant 0 : index
      %c0_25 = arith.constant 0 : index
      %31 = vector.load %arg5[%c0_24, %c0_25] : memref<1x32xf32, #tpu.memory_space<vmem>>, vector<1x32xf32>
      %cst_26 = arith.constant dense<0.000000e+00> : vector<8xf32>
      %32 = vector.multi_reduction <add>, %29, %cst_26 [1] : vector<8x32xf32> to vector<8xf32>
      %33 = vector.shape_cast %32 : vector<8xf32> to vector<8x1xf32>
      %cst_27 = arith.constant 3.200000e+01 : f32
      %34 = vector.broadcast %cst_27 : f32 to vector<8x1xf32>
      %35 = arith.divf %33, %34 : vector<8x1xf32>
      %36 = vector.broadcast %35 : vector<8x1xf32> to vector<8x32xf32>
      %37 = arith.subf %29, %36 : vector<8x32xf32>
      %38 = arith.mulf %37, %37 : vector<8x32xf32>
      %cst_28 = arith.constant dense<0.000000e+00> : vector<8xf32>
      %39 = vector.multi_reduction <add>, %38, %cst_28 [1] : vector<8x32xf32> to vector<8xf32>
      %40 = vector.shape_cast %39 : vector<8xf32> to vector<8x1xf32>
      %cst_29 = arith.constant 3.200000e+01 : f32
      %41 = vector.broadcast %cst_29 : f32 to vector<8x1xf32>
      %42 = arith.divf %40, %41 : vector<8x1xf32>
      %cst_30 = arith.constant 9.99999974E-6 : f32
      %43 = vector.broadcast %cst_30 : f32 to vector<8x1xf32>
      %44 = arith.addf %42, %43 : vector<8x1xf32>
      %45 = math.rsqrt %44 : vector<8x1xf32>
      %46 = vector.broadcast %45 : vector<8x1xf32> to vector<8x32xf32>
      %47 = arith.mulf %37, %46 : vector<8x32xf32>
      %48 = vector.broadcast %30 : vector<1x32xf32> to vector<8x32xf32>
      %49 = arith.mulf %47, %48 : vector<8x32xf32>
      %50 = vector.broadcast %31 : vector<1x32xf32> to vector<8x32xf32>
      %51 = arith.addf %49, %50 : vector<8x32xf32>
      %52 = arith.truncf %51 : vector<8x32xf32> to vector<8x32xbf16>
      %c0_31 = arith.constant 0 : index
      %c0_32 = arith.constant 0 : index
      %53 = vector.load %arg9[%c0_31, %c0_32] : memref<8x32xbf16, #tpu.memory_space<vmem>>, vector<8x32xbf16>
      tpu.vector_store %arg9[%c0_31, %c0_32], %52 {strides = array<i32>} : memref<8x32xbf16, #tpu.memory_space<vmem>>, vector<8x32xbf16>,
      %cst_33 = arith.constant -1.000000e+30 : f32
      %54 = vector.broadcast %cst_33 : f32 to vector<8x1xf32>
      %c0_34 = arith.constant 0 : index
      %c0_35 = arith.constant 0 : index
      %55 = vector.load %arg10[%c0_34, %c0_35] : memref<8x1xf32, #tpu.memory_space<vmem>>, vector<8x1xf32>
      tpu.vector_store %arg10[%c0_34, %c0_35], %54 {strides = array<i32>} : memref<8x1xf32, #tpu.memory_space<vmem>>, vector<8x1xf32>,
      %cst_36 = arith.constant 0.000000e+00 : f32
      %56 = vector.broadcast %cst_36 : f32 to vector<8x1xf32>
      %c0_37 = arith.constant 0 : index
      %c0_38 = arith.constant 0 : index
      %57 = vector.load %arg11[%c0_37, %c0_38] : memref<8x1xf32, #tpu.memory_space<vmem>>, vector<8x1xf32>
      tpu.vector_store %arg11[%c0_37, %c0_38], %56 {strides = array<i32>} : memref<8x1xf32, #tpu.memory_space<vmem>>, vector<8x1xf32>,
    } else {
    }
    %c0 = arith.constant 0 : index
    %c0_1 = arith.constant 0 : index
    %3 = vector.load %arg9[%c0, %c0_1] : memref<8x32xbf16, #tpu.memory_space<vmem>>, vector<8x32xbf16>
    %c0_2 = arith.constant 0 : index
    %c0_3 = arith.constant 0 : index
    %4 = vector.load %arg6[%c0_2, %c0_3] : memref<32x16xbf16, #tpu.memory_space<vmem>>, vector<32x16xbf16>
    %cst = arith.constant dense<0.000000e+00> : vector<8x16xf32>
    %5 = tpu.matmul %3, %4, %cst {dimension_numbers = #tpu.dot_dimension_numbers<[1], [0], [0], [1], [0, 0, 1, 1], [], []>} : vector<8x32xbf16>, vector<32x16xbf16>, vector<8x16xf32> -> vector<8x16xf32>
    %c0_4 = arith.constant 0 : index
    %c0_5 = arith.constant 0 : index
    %c0_6 = arith.constant 0 : index
    %6 = vector.load %arg7[%c0_4, %c0_5, %c0_6] : memref<1x8x16xf32, #tpu.memory_space<vmem>>, vector<1x8x16xf32>
    %7 = vector.shape_cast %6 : vector<1x8x16xf32> to vector<8x16xf32>
    %8 = vector.shape_cast %5 : vector<8x16xf32> to vector<1x8x16xf32>
    tpu.vector_store %arg7[%c0_4, %c0_5, %c0_6], %8 {strides = array<i32>} : memref<1x8x16xf32, #tpu.memory_space<vmem>>, vector<1x8x16xf32>,
    %c0_7 = arith.constant 0 : index
    %c0_8 = arith.constant 0 : index
    %9 = vector.load %arg10[%c0_7, %c0_8] : memref<8x1xf32, #tpu.memory_space<vmem>>, vector<8x1xf32>
    %cst_9 = arith.constant dense<0xFF800000> : vector<8xf32>
    %10 = vector.multi_reduction <maximumf>, %5, %cst_9 [1] : vector<8x16xf32> to vector<8xf32>
    %11 = vector.shape_cast %10 : vector<8xf32> to vector<8x1xf32>
    %12 = arith.maximumf %9, %11 : vector<8x1xf32>
    %13 = arith.subf %9, %12 : vector<8x1xf32>
    %14 = math.exp %13 : vector<8x1xf32>
    %c0_10 = arith.constant 0 : index
    %c0_11 = arith.constant 0 : index
    %15 = vector.load %arg11[%c0_10, %c0_11] : memref<8x1xf32, #tpu.memory_space<vmem>>, vector<8x1xf32>
    %16 = arith.mulf %14, %15 : vector<8x1xf32>
    %17 = vector.broadcast %12 : vector<8x1xf32> to vector<8x16xf32>
    %18 = arith.subf %5, %17 : vector<8x16xf32>
    %19 = math.exp %18 : vector<8x16xf32>
    %cst_12 = arith.constant dense<0.000000e+00> : vector<8xf32>
    %20 = vector.multi_reduction <add>, %19, %cst_12 [1] : vector<8x16xf32> to vector<8xf32>
    %21 = vector.shape_cast %20 : vector<8xf32> to vector<8x1xf32>
    %22 = arith.addf %16, %21 : vector<8x1xf32>
    %c0_13 = arith.constant 0 : index
    %c0_14 = arith.constant 0 : index
    %23 = vector.load %arg11[%c0_13, %c0_14] : memref<8x1xf32, #tpu.memory_space<vmem>>, vector<8x1xf32>
    tpu.vector_store %arg11[%c0_13, %c0_14], %22 {strides = array<i32>} : memref<8x1xf32, #tpu.memory_space<vmem>>, vector<8x1xf32>,
    %c0_15 = arith.constant 0 : index
    %c0_16 = arith.constant 0 : index
    %24 = vector.load %arg10[%c0_15, %c0_16] : memref<8x1xf32, #tpu.memory_space<vmem>>, vector<8x1xf32>
    tpu.vector_store %arg10[%c0_15, %c0_16], %12 {strides = array<i32>} : memref<8x1xf32, #tpu.memory_space<vmem>>, vector<8x1xf32>,
    %c0_i32_17 = arith.constant 0 : i32
    %25 = arith.cmpi eq, %arg2, %c0_i32_17 : i32
    %26 = arith.extui %25 : i1 to i32
    %c0_i32_18 = arith.constant 0 : i32
    %27 = arith.cmpi ne, %26, %c0_i32_18 : i32
    scf.if %27 {
      %c0_19 = arith.constant 0 : index
      %c0_20 = arith.constant 0 : index
      %28 = vector.load %arg10[%c0_19, %c0_20] : memref<8x1xf32, #tpu.memory_space<vmem>>, vector<8x1xf32>
      %c0_21 = arith.constant 0 : index
      %c0_22 = arith.constant 0 : index
      %29 = vector.load %arg11[%c0_21, %c0_22] : memref<8x1xf32, #tpu.memory_space<vmem>>, vector<8x1xf32>
      %30 = math.log %29 : vector<8x1xf32>
      %31 = arith.addf %28, %30 : vector<8x1xf32>
      %c0_23 = arith.constant 0 : index
      %c0_24 = arith.constant 0 : index
      %c0_25 = arith.constant 0 : index
      %32 = vector.load %arg8[%c0_23, %c0_24, %c0_25] : memref<1x8x1xf32, #tpu.memory_space<vmem>>, vector<1x8x1xf32>
      %33 = vector.shape_cast %32 : vector<1x8x1xf32> to vector<8x1xf32>
      %34 = vector.shape_cast %31 : vector<8x1xf32> to vector<1x8x1xf32>
      tpu.vector_store %arg8[%c0_23, %c0_24, %c0_25], %34 {strides = array<i32>} : memref<1x8x1xf32, #tpu.memory_space<vmem>>, vector<1x8x1xf32>,
    } else {
    }
    return
  }
  func.func @transform_0(%arg0: i32, %arg1: i32, %arg2: i32) -> (i32, i32, i32) {
    %c0_i32 = arith.constant 0 : i32
    %c0_i32_0 = arith.constant 0 : i32
    return %arg0, %arg1, %c0_i32 : i32, i32, i32
  }
  func.func @transform_1(%arg0: i32, %arg1: i32, %arg2: i32) -> (i32, i32) {
    %c0_i32 = arith.constant 0 : i32
    %c0_i32_0 = arith.constant 0 : i32
    %c0_i32_1 = arith.constant 0 : i32
    return %c0_i32, %c0_i32_0 : i32, i32
  }
  func.func @transform_2(%arg0: i32, %arg1: i32, %arg2: i32) -> (i32, i32) {
    %c0_i32 = arith.constant 0 : i32
    %c0_i32_0 = arith.constant 0 : i32
    %c0_i32_1 = arith.constant 0 : i32
    return %c0_i32, %c0_i32_0 : i32, i32
  }
  func.func @transform_3(%arg0: i32, %arg1: i32, %arg2: i32) -> (i32, i32) {
    %c0_i32 = arith.constant 0 : i32
    %c0_i32_0 = arith.constant 0 : i32
    return %c0_i32, %arg2 : i32, i32
  }
  func.func @transform_4(%arg0: i32, %arg1: i32, %arg2: i32) -> (i32, i32, i32) {
    %c0_i32 = arith.constant 0 : i32
    return %arg0, %arg1, %arg2 : i32, i32, i32
  }
  func.func @transform_5(%arg0: i32, %arg1: i32, %arg2: i32) -> (i32, i32, i32) {
    %c0_i32 = arith.constant 0 : i32
    %c0_i32_0 = arith.constant 0 : i32
    return %arg0, %arg1, %c0_i32 : i32, i32, i32
  }
}

module attributes {stable_mosaic.version = 11 : i64} {
  func.func @decoder_layer_kernel(%arg0: i32, %arg1: i32, %arg2: i32, %arg3: memref<1x8x32xf32, #tpu.memory_space<vmem>>, %arg4: memref<1x8x32xf32, #tpu.memory_space<vmem>>, %arg5: memref<1x32xf32, #tpu.memory_space<vmem>>, %arg6: memref<1x32xf32, #tpu.memory_space<vmem>>, %arg7: memref<32x64xbf16, #tpu.memory_space<vmem>>, %arg8: memref<1x64xf32, #tpu.memory_space<vmem>>, %arg9: memref<32x128xbf16, #tpu.memory_space<vmem>>, %arg10: memref<1x128xf32, #tpu.memory_space<vmem>>, %arg11: memref<64x32xbf16, #tpu.memory_space<vmem>>, %arg12: memref<1x32xf32, #tpu.memory_space<vmem>>, %arg13: memref<1x32xf32, #tpu.memory_space<vmem>>, %arg14: memref<1x32xf32, #tpu.memory_space<vmem>>, %arg15: memref<32x64xbf16, #tpu.memory_space<vmem>>, %arg16: memref<1x64xf32, #tpu.memory_space<vmem>>, %arg17: memref<64x32xbf16, #tpu.memory_space<vmem>>, %arg18: memref<1x32xf32, #tpu.memory_space<vmem>>, %arg19: memref<1x8x32xf32, #tpu.memory_space<vmem>>, %arg20: memref<8x64xbf16, #tpu.memory_space<vmem>>, %arg21: memref<2x8x1xf32, #tpu.memory_space<vmem>>, %arg22: memref<2x8x1xf32, #tpu.memory_space<vmem>>, %arg23: memref<2x8x32xf32, #tpu.memory_space<vmem>>) attributes {dimension_semantics = [#tpu.dimension_semantics<parallel>, #tpu.dimension_semantics<parallel>, #tpu.dimension_semantics<arbitrary>], iteration_bounds = array<i64: 2, 1, 1>, scalar_prefetch = 0 : i64, scratch_operands = 4 : i64, tpu.core_type = #tpu.core_type<tc>, window_params = [{transform_indices = @transform_0, window_bounds = array<i64: 1, 8, 32>}, {transform_indices = @transform_1, window_bounds = array<i64: 1, 8, 32>}, {pipeline_mode = #tpu.pipeline_mode<synchronous>, transform_indices = @transform_2, window_bounds = array<i64: 1, 32>}, {pipeline_mode = #tpu.pipeline_mode<synchronous>, transform_indices = @transform_3, window_bounds = array<i64: 1, 32>}, {pipeline_mode = #tpu.pipeline_mode<synchronous>, transform_indices = @transform_4, window_bounds = array<i64: 32, 64>}, {pipeline_mode = #tpu.pipeline_mode<synchronous>, transform_indices = @transform_5, window_bounds = array<i64: 1, 64>}, {pipeline_mode = #tpu.pipeline_mode<synchronous>, transform_indices = @transform_6, window_bounds = array<i64: 32, 128>}, {pipeline_mode = #tpu.pipeline_mode<synchronous>, transform_indices = @transform_7, window_bounds = array<i64: 1, 128>}, {pipeline_mode = #tpu.pipeline_mode<synchronous>, transform_indices = @transform_8, window_bounds = array<i64: 64, 32>}, {pipeline_mode = #tpu.pipeline_mode<synchronous>, transform_indices = @transform_9, window_bounds = array<i64: 1, 32>}, {pipeline_mode = #tpu.pipeline_mode<synchronous>, transform_indices = @transform_10, window_bounds = array<i64: 1, 32>}, {pipeline_mode = #tpu.pipeline_mode<synchronous>, transform_indices = @transform_11, window_bounds = array<i64: 1, 32>}, {pipeline_mode = #tpu.pipeline_mode<synchronous>, transform_indices = @transform_12, window_bounds = array<i64: 32, 64>}, {pipeline_mode = #tpu.pipeline_mode<synchronous>, transform_indices = @transform_13, window_bounds = array<i64: 1, 64>}, {pipeline_mode = #tpu.pipeline_mode<synchronous>, transform_indices = @transform_14, window_bounds = array<i64: 64, 32>}, {pipeline_mode = #tpu.pipeline_mode<synchronous>, transform_indices = @transform_15, window_bounds = array<i64: 1, 32>}, {transform_indices = @transform_16, window_bounds = array<i64: 1, 8, 32>}]} {
    %c0_i32 = arith.constant 0 : i32
    %0 = arith.cmpi eq, %arg2, %c0_i32 : i32
    %1 = arith.extui %0 : i1 to i32
    %c0_i32_0 = arith.constant 0 : i32
    %2 = arith.cmpi ne, %1, %c0_i32_0 : i32
    scf.if %2 {
      %c0 = arith.constant 0 : index
      %c0_3 = arith.constant 0 : index
      %c0_4 = arith.constant 0 : index
      %9 = vector.load %arg3[%c0, %c0_3, %c0_4] : memref<1x8x32xf32, #tpu.memory_space<vmem>>, vector<1x8x32xf32>
      %10 = vector.shape_cast %9 : vector<1x8x32xf32> to vector<8x32xf32>
      %c0_5 = arith.constant 0 : index
      %c0_6 = arith.constant 0 : index
      %11 = vector.load %arg5[%c0_5, %c0_6] : memref<1x32xf32, #tpu.memory_space<vmem>>, vector<1x32xf32>
      %c0_7 = arith.constant 0 : index
      %c0_8 = arith.constant 0 : index
      %12 = vector.load %arg6[%c0_7, %c0_8] : memref<1x32xf32, #tpu.memory_space<vmem>>, vector<1x32xf32>
      %cst = arith.constant dense<0.000000e+00> : vector<8xf32>
      %13 = vector.multi_reduction <add>, %10, %cst [1] : vector<8x32xf32> to vector<8xf32>
      %14 = vector.shape_cast %13 : vector<8xf32> to vector<8x1xf32>
      %cst_9 = arith.constant 3.200000e+01 : f32
      %15 = vector.broadcast %cst_9 : f32 to vector<8x1xf32>
      %16 = arith.divf %14, %15 : vector<8x1xf32>
      %17 = vector.broadcast %16 : vector<8x1xf32> to vector<8x32xf32>
      %18 = arith.subf %10, %17 : vector<8x32xf32>
      %19 = arith.mulf %18, %18 : vector<8x32xf32>
      %cst_10 = arith.constant dense<0.000000e+00> : vector<8xf32>
      %20 = vector.multi_reduction <add>, %19, %cst_10 [1] : vector<8x32xf32> to vector<8xf32>
      %21 = vector.shape_cast %20 : vector<8xf32> to vector<8x1xf32>
      %cst_11 = arith.constant 3.200000e+01 : f32
      %22 = vector.broadcast %cst_11 : f32 to vector<8x1xf32>
      %23 = arith.divf %21, %22 : vector<8x1xf32>
      %cst_12 = arith.constant 9.99999974E-6 : f32
      %24 = vector.broadcast %cst_12 : f32 to vector<8x1xf32>
      %25 = arith.addf %23, %24 : vector<8x1xf32>
      %26 = math.rsqrt %25 : vector<8x1xf32>
      %27 = vector.broadcast %26 : vector<8x1xf32> to vector<8x32xf32>
      %28 = arith.mulf %18, %27 : vector<8x32xf32>
      %29 = vector.broadcast %11 : vector<1x32xf32> to vector<8x32xf32>
      %30 = arith.mulf %28, %29 : vector<8x32xf32>
      %31 = vector.broadcast %12 : vector<1x32xf32> to vector<8x32xf32>
      %32 = arith.addf %30, %31 : vector<8x32xf32>
      %33 = arith.truncf %32 : vector<8x32xf32> to vector<8x32xbf16>
      %c0_13 = arith.constant 0 : index
      %c0_14 = arith.constant 0 : index
      %34 = vector.load %arg7[%c0_13, %c0_14] : memref<32x64xbf16, #tpu.memory_space<vmem>>, vector<32x64xbf16>
      %cst_15 = arith.constant dense<0.000000e+00> : vector<8x64xf32>
      %35 = tpu.matmul %33, %34, %cst_15 {dimension_numbers = #tpu.dot_dimension_numbers<[1], [0], [0], [1], [0, 0, 1, 1], [], []>} : vector<8x32xbf16>, vector<32x64xbf16>, vector<8x64xf32> -> vector<8x64xf32>
      %c0_16 = arith.constant 0 : index
      %c0_17 = arith.constant 0 : index
      %36 = vector.load %arg8[%c0_16, %c0_17] : memref<1x64xf32, #tpu.memory_space<vmem>>, vector<1x64xf32>
      %37 = vector.broadcast %36 : vector<1x64xf32> to vector<8x64xf32>
      %38 = arith.addf %35, %37 : vector<8x64xf32>
      %cst_18 = arith.constant 0.176776692 : f32
      %39 = vector.broadcast %cst_18 : f32 to vector<8x64xf32>
      %40 = arith.mulf %38, %39 : vector<8x64xf32>
      %41 = arith.truncf %40 : vector<8x64xf32> to vector<8x64xbf16>
      %c0_19 = arith.constant 0 : index
      %c0_20 = arith.constant 0 : index
      %42 = vector.load %arg20[%c0_19, %c0_20] : memref<8x64xbf16, #tpu.memory_space<vmem>>, vector<8x64xbf16>
      tpu.vector_store %arg20[%c0_19, %c0_20], %41 {strides = array<i32>} : memref<8x64xbf16, #tpu.memory_space<vmem>>, vector<8x64xbf16>,
      %cst_21 = arith.constant -1.000000e+30 : f32
      %43 = vector.broadcast %cst_21 : f32 to vector<2x8x1xf32>
      %c0_22 = arith.constant 0 : index
      %c0_23 = arith.constant 0 : index
      %c0_24 = arith.constant 0 : index
      %44 = vector.load %arg21[%c0_22, %c0_23, %c0_24] : memref<2x8x1xf32, #tpu.memory_space<vmem>>, vector<2x8x1xf32>
      tpu.vector_store %arg21[%c0_22, %c0_23, %c0_24], %43 {strides = array<i32>} : memref<2x8x1xf32, #tpu.memory_space<vmem>>, vector<2x8x1xf32>,
      %cst_25 = arith.constant 0.000000e+00 : f32
      %45 = vector.broadcast %cst_25 : f32 to vector<2x8x1xf32>
      %c0_26 = arith.constant 0 : index
      %c0_27 = arith.constant 0 : index
      %c0_28 = arith.constant 0 : index
      %46 = vector.load %arg22[%c0_26, %c0_27, %c0_28] : memref<2x8x1xf32, #tpu.memory_space<vmem>>, vector<2x8x1xf32>
      tpu.vector_store %arg22[%c0_26, %c0_27, %c0_28], %45 {strides = array<i32>} : memref<2x8x1xf32, #tpu.memory_space<vmem>>, vector<2x8x1xf32>,
      %cst_29 = arith.constant 0.000000e+00 : f32
      %47 = vector.broadcast %cst_29 : f32 to vector<2x8x32xf32>
      %c0_30 = arith.constant 0 : index
      %c0_31 = arith.constant 0 : index
      %c0_32 = arith.constant 0 : index
      %48 = vector.load %arg23[%c0_30, %c0_31, %c0_32] : memref<2x8x32xf32, #tpu.memory_space<vmem>>, vector<2x8x32xf32>
      tpu.vector_store %arg23[%c0_30, %c0_31, %c0_32], %47 {strides = array<i32>} : memref<2x8x32xf32, #tpu.memory_space<vmem>>, vector<2x8x32xf32>,
    } else {
    }
    %3 = arith.cmpi sle, %arg2, %arg1 : i32
    %4 = arith.extui %3 : i1 to i32
    %c0_i32_1 = arith.constant 0 : i32
    %5 = arith.cmpi ne, %4, %c0_i32_1 : i32
    scf.if %5 {
      %c0 = arith.constant 0 : index
      %c0_3 = arith.constant 0 : index
      %c0_4 = arith.constant 0 : index
      %9 = vector.load %arg4[%c0, %c0_3, %c0_4] : memref<1x8x32xf32, #tpu.memory_space<vmem>>, vector<1x8x32xf32>
      %10 = vector.shape_cast %9 : vector<1x8x32xf32> to vector<8x32xf32>
      %c0_5 = arith.constant 0 : index
      %c0_6 = arith.constant 0 : index
      %11 = vector.load %arg5[%c0_5, %c0_6] : memref<1x32xf32, #tpu.memory_space<vmem>>, vector<1x32xf32>
      %c0_7 = arith.constant 0 : index
      %c0_8 = arith.constant 0 : index
      %12 = vector.load %arg6[%c0_7, %c0_8] : memref<1x32xf32, #tpu.memory_space<vmem>>, vector<1x32xf32>
      %cst = arith.constant dense<0.000000e+00> : vector<8xf32>
      %13 = vector.multi_reduction <add>, %10, %cst [1] : vector<8x32xf32> to vector<8xf32>
      %14 = vector.shape_cast %13 : vector<8xf32> to vector<8x1xf32>
      %cst_9 = arith.constant 3.200000e+01 : f32
      %15 = vector.broadcast %cst_9 : f32 to vector<8x1xf32>
      %16 = arith.divf %14, %15 : vector<8x1xf32>
      %17 = vector.broadcast %16 : vector<8x1xf32> to vector<8x32xf32>
      %18 = arith.subf %10, %17 : vector<8x32xf32>
      %19 = arith.mulf %18, %18 : vector<8x32xf32>
      %cst_10 = arith.constant dense<0.000000e+00> : vector<8xf32>
      %20 = vector.multi_reduction <add>, %19, %cst_10 [1] : vector<8x32xf32> to vector<8xf32>
      %21 = vector.shape_cast %20 : vector<8xf32> to vector<8x1xf32>
      %cst_11 = arith.constant 3.200000e+01 : f32
      %22 = vector.broadcast %cst_11 : f32 to vector<8x1xf32>
      %23 = arith.divf %21, %22 : vector<8x1xf32>
      %cst_12 = arith.constant 9.99999974E-6 : f32
      %24 = vector.broadcast %cst_12 : f32 to vector<8x1xf32>
      %25 = arith.addf %23, %24 : vector<8x1xf32>
      %26 = math.rsqrt %25 : vector<8x1xf32>
      %27 = vector.broadcast %26 : vector<8x1xf32> to vector<8x32xf32>
      %28 = arith.mulf %18, %27 : vector<8x32xf32>
      %29 = vector.broadcast %11 : vector<1x32xf32> to vector<8x32xf32>
      %30 = arith.mulf %28, %29 : vector<8x32xf32>
      %31 = vector.broadcast %12 : vector<1x32xf32> to vector<8x32xf32>
      %32 = arith.addf %30, %31 : vector<8x32xf32>
      %33 = arith.truncf %32 : vector<8x32xf32> to vector<8x32xbf16>
      %c0_13 = arith.constant 0 : index
      %c0_14 = arith.constant 0 : index
      %34 = vector.load %arg9[%c0_13, %c0_14] : memref<32x128xbf16, #tpu.memory_space<vmem>>, vector<32x128xbf16>
      %cst_15 = arith.constant dense<0.000000e+00> : vector<8x128xf32>
      %35 = tpu.matmul %33, %34, %cst_15 {dimension_numbers = #tpu.dot_dimension_numbers<[1], [0], [0], [1], [0, 0, 1, 1], [], []>} : vector<8x32xbf16>, vector<32x128xbf16>, vector<8x128xf32> -> vector<8x128xf32>
      %c0_16 = arith.constant 0 : index
      %c0_17 = arith.constant 0 : index
      %36 = vector.load %arg10[%c0_16, %c0_17] : memref<1x128xf32, #tpu.memory_space<vmem>>, vector<1x128xf32>
      %37 = vector.broadcast %36 : vector<1x128xf32> to vector<8x128xf32>
      %38 = arith.addf %35, %37 : vector<8x128xf32>
      %39 = vector.extract_strided_slice %38 {offsets = [0, 0], sizes = [8, 64], strides = [1, 1]} : vector<8x128xf32> to vector<8x64xf32>
      %40 = vector.extract_strided_slice %38 {offsets = [0, 64], sizes = [8, 64], strides = [1, 1]} : vector<8x128xf32> to vector<8x64xf32>
      %c0_18 = arith.constant 0 : index
      %c0_19 = arith.constant 0 : index
      %41 = vector.load %arg20[%c0_18, %c0_19] : memref<8x64xbf16, #tpu.memory_space<vmem>>, vector<8x64xbf16>
      %c8_i32 = arith.constant 8 : i32
      %42 = arith.muli %arg1, %c8_i32 : i32
      %43 = tpu.iota {dimensions = array<i32: 0>} : vector<8x8xi32>
      %44 = vector.broadcast %42 : i32 to vector<8x8xi32>
      %45 = arith.addi %44, %43 : vector<8x8xi32>
      %c8_i32_20 = arith.constant 8 : i32
      %46 = arith.muli %arg2, %c8_i32_20 : i32
      %47 = tpu.iota {dimensions = array<i32: 1>} : vector<8x8xi32>
      %48 = vector.broadcast %46 : i32 to vector<8x8xi32>
      %49 = arith.addi %48, %47 : vector<8x8xi32>
      %50 = arith.cmpi sle, %49, %45 : vector<8x8xi32>
      %cst_21 = arith.constant 0.000000e+00 : f32
      %cst_22 = arith.constant -1.000000e+30 : f32
      %51 = vector.broadcast %cst_21 : f32 to vector<8x8xf32>
      %52 = vector.broadcast %cst_22 : f32 to vector<8x8xf32>
      %53 = arith.select %50, %51, %52 : vector<8x8xi1>, vector<8x8xf32>
      %54 = vector.extract_strided_slice %41 {offsets = [0, 0], sizes = [8, 32], strides = [1, 1]} : vector<8x64xbf16> to vector<8x32xbf16>
      %55 = vector.extract_strided_slice %39 {offsets = [0, 0], sizes = [8, 32], strides = [1, 1]} : vector<8x64xf32> to vector<8x32xf32>
      %56 = arith.truncf %55 : vector<8x32xf32> to vector<8x32xbf16>
      %57 = vector.extract_strided_slice %40 {offsets = [0, 0], sizes = [8, 32], strides = [1, 1]} : vector<8x64xf32> to vector<8x32xf32>
      %58 = arith.truncf %57 : vector<8x32xf32> to vector<8x32xbf16>
      %cst_23 = arith.constant dense<0.000000e+00> : vector<8x8xf32>
      %59 = tpu.matmul %54, %56, %cst_23 {dimension_numbers = #tpu.dot_dimension_numbers<[1], [1], [0], [0], [0, 0, 1, 0], [], []>} : vector<8x32xbf16>, vector<8x32xbf16>, vector<8x8xf32> -> vector<8x8xf32>
      %60 = arith.addf %59, %53 : vector<8x8xf32>
      %c0_24 = arith.constant 0 : index
      %c0_25 = arith.constant 0 : index
      %c0_26 = arith.constant 0 : index
      %61 = vector.load %arg21[%c0_24, %c0_25, %c0_26] : memref<2x8x1xf32, #tpu.memory_space<vmem>>, vector<1x8x1xf32>
      %62 = vector.shape_cast %61 : vector<1x8x1xf32> to vector<8x1xf32>
      %cst_27 = arith.constant dense<0xFF800000> : vector<8xf32>
      %63 = vector.multi_reduction <maximumf>, %60, %cst_27 [1] : vector<8x8xf32> to vector<8xf32>
      %64 = vector.shape_cast %63 : vector<8xf32> to vector<8x1xf32>
      %65 = arith.maximumf %62, %64 : vector<8x1xf32>
      %66 = arith.subf %62, %65 : vector<8x1xf32>
      %67 = math.exp %66 : vector<8x1xf32>
      %68 = vector.broadcast %65 : vector<8x1xf32> to vector<8x8xf32>
      %69 = arith.subf %60, %68 : vector<8x8xf32>
      %70 = math.exp %69 : vector<8x8xf32>
      %c0_28 = arith.constant 0 : index
      %c0_29 = arith.constant 0 : index
      %c0_30 = arith.constant 0 : index
      %71 = vector.load %arg22[%c0_28, %c0_29, %c0_30] : memref<2x8x1xf32, #tpu.memory_space<vmem>>, vector<1x8x1xf32>
      %72 = vector.shape_cast %71 : vector<1x8x1xf32> to vector<8x1xf32>
      %73 = arith.mulf %67, %72 : vector<8x1xf32>
      %cst_31 = arith.constant dense<0.000000e+00> : vector<8xf32>
      %74 = vector.multi_reduction <add>, %70, %cst_31 [1] : vector<8x8xf32> to vector<8xf32>
      %75 = vector.shape_cast %74 : vector<8xf32> to vector<8x1xf32>
      %76 = arith.addf %73, %75 : vector<8x1xf32>
      %c0_32 = arith.constant 0 : index
      %c0_33 = arith.constant 0 : index
      %c0_34 = arith.constant 0 : index
      %77 = vector.load %arg22[%c0_32, %c0_33, %c0_34] : memref<2x8x1xf32, #tpu.memory_space<vmem>>, vector<1x8x1xf32>
      %78 = vector.shape_cast %77 : vector<1x8x1xf32> to vector<8x1xf32>
      %79 = vector.shape_cast %76 : vector<8x1xf32> to vector<1x8x1xf32>
      tpu.vector_store %arg22[%c0_32, %c0_33, %c0_34], %79 {strides = array<i32>} : memref<2x8x1xf32, #tpu.memory_space<vmem>>, vector<1x8x1xf32>,
      %c0_35 = arith.constant 0 : index
      %c0_36 = arith.constant 0 : index
      %c0_37 = arith.constant 0 : index
      %80 = vector.load %arg23[%c0_35, %c0_36, %c0_37] : memref<2x8x32xf32, #tpu.memory_space<vmem>>, vector<1x8x32xf32>
      %81 = vector.shape_cast %80 : vector<1x8x32xf32> to vector<8x32xf32>
      %82 = vector.broadcast %67 : vector<8x1xf32> to vector<8x32xf32>
      %83 = arith.mulf %82, %81 : vector<8x32xf32>
      %84 = arith.truncf %70 : vector<8x8xf32> to vector<8x8xbf16>
      %cst_38 = arith.constant dense<0.000000e+00> : vector<8x32xf32>
      %85 = tpu.matmul %84, %58, %cst_38 {dimension_numbers = #tpu.dot_dimension_numbers<[1], [0], [0], [1], [0, 0, 1, 1], [], []>} : vector<8x8xbf16>, vector<8x32xbf16>, vector<8x32xf32> -> vector<8x32xf32>
      %86 = arith.addf %83, %85 : vector<8x32xf32>
      %c0_39 = arith.constant 0 : index
      %c0_40 = arith.constant 0 : index
      %c0_41 = arith.constant 0 : index
      %87 = vector.load %arg23[%c0_39, %c0_40, %c0_41] : memref<2x8x32xf32, #tpu.memory_space<vmem>>, vector<1x8x32xf32>
      %88 = vector.shape_cast %87 : vector<1x8x32xf32> to vector<8x32xf32>
      %89 = vector.shape_cast %86 : vector<8x32xf32> to vector<1x8x32xf32>
      tpu.vector_store %arg23[%c0_39, %c0_40, %c0_41], %89 {strides = array<i32>} : memref<2x8x32xf32, #tpu.memory_space<vmem>>, vector<1x8x32xf32>,
      %c0_42 = arith.constant 0 : index
      %c0_43 = arith.constant 0 : index
      %c0_44 = arith.constant 0 : index
      %90 = vector.load %arg21[%c0_42, %c0_43, %c0_44] : memref<2x8x1xf32, #tpu.memory_space<vmem>>, vector<1x8x1xf32>
      %91 = vector.shape_cast %90 : vector<1x8x1xf32> to vector<8x1xf32>
      %92 = vector.shape_cast %65 : vector<8x1xf32> to vector<1x8x1xf32>
      tpu.vector_store %arg21[%c0_42, %c0_43, %c0_44], %92 {strides = array<i32>} : memref<2x8x1xf32, #tpu.memory_space<vmem>>, vector<1x8x1xf32>,
      %93 = vector.extract_strided_slice %41 {offsets = [0, 32], sizes = [8, 32], strides = [1, 1]} : vector<8x64xbf16> to vector<8x32xbf16>
      %94 = vector.extract_strided_slice %39 {offsets = [0, 32], sizes = [8, 32], strides = [1, 1]} : vector<8x64xf32> to vector<8x32xf32>
      %95 = arith.truncf %94 : vector<8x32xf32> to vector<8x32xbf16>
      %96 = vector.extract_strided_slice %40 {offsets = [0, 32], sizes = [8, 32], strides = [1, 1]} : vector<8x64xf32> to vector<8x32xf32>
      %97 = arith.truncf %96 : vector<8x32xf32> to vector<8x32xbf16>
      %cst_45 = arith.constant dense<0.000000e+00> : vector<8x8xf32>
      %98 = tpu.matmul %93, %95, %cst_45 {dimension_numbers = #tpu.dot_dimension_numbers<[1], [1], [0], [0], [0, 0, 1, 0], [], []>} : vector<8x32xbf16>, vector<8x32xbf16>, vector<8x8xf32> -> vector<8x8xf32>
      %99 = arith.addf %98, %53 : vector<8x8xf32>
      %c1 = arith.constant 1 : index
      %c0_46 = arith.constant 0 : index
      %c0_47 = arith.constant 0 : index
      %100 = vector.load %arg21[%c1, %c0_46, %c0_47] : memref<2x8x1xf32, #tpu.memory_space<vmem>>, vector<1x8x1xf32>
      %101 = vector.shape_cast %100 : vector<1x8x1xf32> to vector<8x1xf32>
      %cst_48 = arith.constant dense<0xFF800000> : vector<8xf32>
      %102 = vector.multi_reduction <maximumf>, %99, %cst_48 [1] : vector<8x8xf32> to vector<8xf32>
      %103 = vector.shape_cast %102 : vector<8xf32> to vector<8x1xf32>
      %104 = arith.maximumf %101, %103 : vector<8x1xf32>
      %105 = arith.subf %101, %104 : vector<8x1xf32>
      %106 = math.exp %105 : vector<8x1xf32>
      %107 = vector.broadcast %104 : vector<8x1xf32> to vector<8x8xf32>
      %108 = arith.subf %99, %107 : vector<8x8xf32>
      %109 = math.exp %108 : vector<8x8xf32>
      %c1_49 = arith.constant 1 : index
      %c0_50 = arith.constant 0 : index
      %c0_51 = arith.constant 0 : index
      %110 = vector.load %arg22[%c1_49, %c0_50, %c0_51] : memref<2x8x1xf32, #tpu.memory_space<vmem>>, vector<1x8x1xf32>
      %111 = vector.shape_cast %110 : vector<1x8x1xf32> to vector<8x1xf32>
      %112 = arith.mulf %106, %111 : vector<8x1xf32>
      %cst_52 = arith.constant dense<0.000000e+00> : vector<8xf32>
      %113 = vector.multi_reduction <add>, %109, %cst_52 [1] : vector<8x8xf32> to vector<8xf32>
      %114 = vector.shape_cast %113 : vector<8xf32> to vector<8x1xf32>
      %115 = arith.addf %112, %114 : vector<8x1xf32>
      %c1_53 = arith.constant 1 : index
      %c0_54 = arith.constant 0 : index
      %c0_55 = arith.constant 0 : index
      %116 = vector.load %arg22[%c1_53, %c0_54, %c0_55] : memref<2x8x1xf32, #tpu.memory_space<vmem>>, vector<1x8x1xf32>
      %117 = vector.shape_cast %116 : vector<1x8x1xf32> to vector<8x1xf32>
      %118 = vector.shape_cast %115 : vector<8x1xf32> to vector<1x8x1xf32>
      tpu.vector_store %arg22[%c1_53, %c0_54, %c0_55], %118 {strides = array<i32>} : memref<2x8x1xf32, #tpu.memory_space<vmem>>, vector<1x8x1xf32>,
      %c1_56 = arith.constant 1 : index
      %c0_57 = arith.constant 0 : index
      %c0_58 = arith.constant 0 : index
      %119 = vector.load %arg23[%c1_56, %c0_57, %c0_58] : memref<2x8x32xf32, #tpu.memory_space<vmem>>, vector<1x8x32xf32>
      %120 = vector.shape_cast %119 : vector<1x8x32xf32> to vector<8x32xf32>
      %121 = vector.broadcast %106 : vector<8x1xf32> to vector<8x32xf32>
      %122 = arith.mulf %121, %120 : vector<8x32xf32>
      %123 = arith.truncf %109 : vector<8x8xf32> to vector<8x8xbf16>
      %cst_59 = arith.constant dense<0.000000e+00> : vector<8x32xf32>
      %124 = tpu.matmul %123, %97, %cst_59 {dimension_numbers = #tpu.dot_dimension_numbers<[1], [0], [0], [1], [0, 0, 1, 1], [], []>} : vector<8x8xbf16>, vector<8x32xbf16>, vector<8x32xf32> -> vector<8x32xf32>
      %125 = arith.addf %122, %124 : vector<8x32xf32>
      %c1_60 = arith.constant 1 : index
      %c0_61 = arith.constant 0 : index
      %c0_62 = arith.constant 0 : index
      %126 = vector.load %arg23[%c1_60, %c0_61, %c0_62] : memref<2x8x32xf32, #tpu.memory_space<vmem>>, vector<1x8x32xf32>
      %127 = vector.shape_cast %126 : vector<1x8x32xf32> to vector<8x32xf32>
      %128 = vector.shape_cast %125 : vector<8x32xf32> to vector<1x8x32xf32>
      tpu.vector_store %arg23[%c1_60, %c0_61, %c0_62], %128 {strides = array<i32>} : memref<2x8x32xf32, #tpu.memory_space<vmem>>, vector<1x8x32xf32>,
      %c1_63 = arith.constant 1 : index
      %c0_64 = arith.constant 0 : index
      %c0_65 = arith.constant 0 : index
      %129 = vector.load %arg21[%c1_63, %c0_64, %c0_65] : memref<2x8x1xf32, #tpu.memory_space<vmem>>, vector<1x8x1xf32>
      %130 = vector.shape_cast %129 : vector<1x8x1xf32> to vector<8x1xf32>
      %131 = vector.shape_cast %104 : vector<8x1xf32> to vector<1x8x1xf32>
      tpu.vector_store %arg21[%c1_63, %c0_64, %c0_65], %131 {strides = array<i32>} : memref<2x8x1xf32, #tpu.memory_space<vmem>>, vector<1x8x1xf32>,
    } else {
    }
    %6 = arith.cmpi eq, %arg2, %arg1 : i32
    %7 = arith.extui %6 : i1 to i32
    %c0_i32_2 = arith.constant 0 : i32
    %8 = arith.cmpi ne, %7, %c0_i32_2 : i32
    scf.if %8 {
      %c0 = arith.constant 0 : index
      %c0_3 = arith.constant 0 : index
      %c0_4 = arith.constant 0 : index
      %9 = vector.load %arg3[%c0, %c0_3, %c0_4] : memref<1x8x32xf32, #tpu.memory_space<vmem>>, vector<1x8x32xf32>
      %10 = vector.shape_cast %9 : vector<1x8x32xf32> to vector<8x32xf32>
      %cst = arith.constant 0.000000e+00 : f32
      %11 = vector.broadcast %cst : f32 to vector<8x32xf32>
      %c0_5 = arith.constant 0 : index
      %c0_6 = arith.constant 0 : index
      %c0_7 = arith.constant 0 : index
      %12 = vector.load %arg23[%c0_5, %c0_6, %c0_7] : memref<2x8x32xf32, #tpu.memory_space<vmem>>, vector<1x8x32xf32>
      %13 = vector.shape_cast %12 : vector<1x8x32xf32> to vector<8x32xf32>
      %c0_8 = arith.constant 0 : index
      %c0_9 = arith.constant 0 : index
      %c0_10 = arith.constant 0 : index
      %14 = vector.load %arg22[%c0_8, %c0_9, %c0_10] : memref<2x8x1xf32, #tpu.memory_space<vmem>>, vector<1x8x1xf32>
      %15 = vector.shape_cast %14 : vector<1x8x1xf32> to vector<8x1xf32>
      %16 = tpu.reciprocal %15 {approx = true} : vector<8x1xf32> -> vector<8x1xf32>
      %17 = vector.broadcast %16 : vector<8x1xf32> to vector<8x32xf32>
      %18 = arith.mulf %13, %17 : vector<8x32xf32>
      %19 = arith.truncf %18 : vector<8x32xf32> to vector<8x32xbf16>
      %c0_11 = arith.constant 0 : index
      %c0_12 = arith.constant 0 : index
      %20 = vector.load %arg11[%c0_11, %c0_12] : memref<64x32xbf16, #tpu.memory_space<vmem>>, vector<32x32xbf16>
      %cst_13 = arith.constant dense<0.000000e+00> : vector<8x32xf32>
      %21 = tpu.matmul %19, %20, %cst_13 {dimension_numbers = #tpu.dot_dimension_numbers<[1], [0], [0], [1], [0, 0, 1, 1], [], []>} : vector<8x32xbf16>, vector<32x32xbf16>, vector<8x32xf32> -> vector<8x32xf32>
      %22 = arith.addf %11, %21 : vector<8x32xf32>
      %c1 = arith.constant 1 : index
      %c0_14 = arith.constant 0 : index
      %c0_15 = arith.constant 0 : index
      %23 = vector.load %arg23[%c1, %c0_14, %c0_15] : memref<2x8x32xf32, #tpu.memory_space<vmem>>, vector<1x8x32xf32>
      %24 = vector.shape_cast %23 : vector<1x8x32xf32> to vector<8x32xf32>
      %c1_16 = arith.constant 1 : index
      %c0_17 = arith.constant 0 : index
      %c0_18 = arith.constant 0 : index
      %25 = vector.load %arg22[%c1_16, %c0_17, %c0_18] : memref<2x8x1xf32, #tpu.memory_space<vmem>>, vector<1x8x1xf32>
      %26 = vector.shape_cast %25 : vector<1x8x1xf32> to vector<8x1xf32>
      %27 = tpu.reciprocal %26 {approx = true} : vector<8x1xf32> -> vector<8x1xf32>
      %28 = vector.broadcast %27 : vector<8x1xf32> to vector<8x32xf32>
      %29 = arith.mulf %24, %28 : vector<8x32xf32>
      %30 = arith.truncf %29 : vector<8x32xf32> to vector<8x32xbf16>
      %c32 = arith.constant 32 : index
      %c0_19 = arith.constant 0 : index
      %31 = vector.load %arg11[%c32, %c0_19] : memref<64x32xbf16, #tpu.memory_space<vmem>>, vector<32x32xbf16>
      %cst_20 = arith.constant dense<0.000000e+00> : vector<8x32xf32>
      %32 = tpu.matmul %30, %31, %cst_20 {dimension_numbers = #tpu.dot_dimension_numbers<[1], [0], [0], [1], [0, 0, 1, 1], [], []>} : vector<8x32xbf16>, vector<32x32xbf16>, vector<8x32xf32> -> vector<8x32xf32>
      %33 = arith.addf %22, %32 : vector<8x32xf32>
      %34 = arith.addf %10, %33 : vector<8x32xf32>
      %c0_21 = arith.constant 0 : index
      %c0_22 = arith.constant 0 : index
      %35 = vector.load %arg12[%c0_21, %c0_22] : memref<1x32xf32, #tpu.memory_space<vmem>>, vector<1x32xf32>
      %36 = vector.broadcast %35 : vector<1x32xf32> to vector<8x32xf32>
      %37 = arith.addf %34, %36 : vector<8x32xf32>
      %c0_23 = arith.constant 0 : index
      %c0_24 = arith.constant 0 : index
      %38 = vector.load %arg13[%c0_23, %c0_24] : memref<1x32xf32, #tpu.memory_space<vmem>>, vector<1x32xf32>
      %c0_25 = arith.constant 0 : index
      %c0_26 = arith.constant 0 : index
      %39 = vector.load %arg14[%c0_25, %c0_26] : memref<1x32xf32, #tpu.memory_space<vmem>>, vector<1x32xf32>
      %cst_27 = arith.constant dense<0.000000e+00> : vector<8xf32>
      %40 = vector.multi_reduction <add>, %37, %cst_27 [1] : vector<8x32xf32> to vector<8xf32>
      %41 = vector.shape_cast %40 : vector<8xf32> to vector<8x1xf32>
      %cst_28 = arith.constant 3.200000e+01 : f32
      %42 = vector.broadcast %cst_28 : f32 to vector<8x1xf32>
      %43 = arith.divf %41, %42 : vector<8x1xf32>
      %44 = vector.broadcast %43 : vector<8x1xf32> to vector<8x32xf32>
      %45 = arith.subf %37, %44 : vector<8x32xf32>
      %46 = arith.mulf %45, %45 : vector<8x32xf32>
      %cst_29 = arith.constant dense<0.000000e+00> : vector<8xf32>
      %47 = vector.multi_reduction <add>, %46, %cst_29 [1] : vector<8x32xf32> to vector<8xf32>
      %48 = vector.shape_cast %47 : vector<8xf32> to vector<8x1xf32>
      %cst_30 = arith.constant 3.200000e+01 : f32
      %49 = vector.broadcast %cst_30 : f32 to vector<8x1xf32>
      %50 = arith.divf %48, %49 : vector<8x1xf32>
      %cst_31 = arith.constant 9.99999974E-6 : f32
      %51 = vector.broadcast %cst_31 : f32 to vector<8x1xf32>
      %52 = arith.addf %50, %51 : vector<8x1xf32>
      %53 = math.rsqrt %52 : vector<8x1xf32>
      %54 = vector.broadcast %53 : vector<8x1xf32> to vector<8x32xf32>
      %55 = arith.mulf %45, %54 : vector<8x32xf32>
      %56 = vector.broadcast %38 : vector<1x32xf32> to vector<8x32xf32>
      %57 = arith.mulf %55, %56 : vector<8x32xf32>
      %58 = vector.broadcast %39 : vector<1x32xf32> to vector<8x32xf32>
      %59 = arith.addf %57, %58 : vector<8x32xf32>
      %60 = arith.truncf %59 : vector<8x32xf32> to vector<8x32xbf16>
      %c0_32 = arith.constant 0 : index
      %c0_33 = arith.constant 0 : index
      %61 = vector.load %arg15[%c0_32, %c0_33] : memref<32x64xbf16, #tpu.memory_space<vmem>>, vector<32x64xbf16>
      %cst_34 = arith.constant dense<0.000000e+00> : vector<8x64xf32>
      %62 = tpu.matmul %60, %61, %cst_34 {dimension_numbers = #tpu.dot_dimension_numbers<[1], [0], [0], [1], [0, 0, 1, 1], [], []>} : vector<8x32xbf16>, vector<32x64xbf16>, vector<8x64xf32> -> vector<8x64xf32>
      %c0_35 = arith.constant 0 : index
      %c0_36 = arith.constant 0 : index
      %63 = vector.load %arg16[%c0_35, %c0_36] : memref<1x64xf32, #tpu.memory_space<vmem>>, vector<1x64xf32>
      %64 = vector.broadcast %63 : vector<1x64xf32> to vector<8x64xf32>
      %65 = arith.addf %62, %64 : vector<8x64xf32>
      %cst_37 = arith.constant 5.000000e-01 : f32
      %66 = vector.broadcast %cst_37 : f32 to vector<8x64xf32>
      %67 = arith.mulf %66, %65 : vector<8x64xf32>
      %cst_38 = arith.constant 0.707106769 : f32
      %68 = vector.broadcast %cst_38 : f32 to vector<8x64xf32>
      %69 = arith.mulf %65, %68 : vector<8x64xf32>
      %70 = math.absf %69 : vector<8x64xf32>
      %cst_39 = arith.constant 0.327591091 : f32
      %71 = vector.broadcast %cst_39 : f32 to vector<8x64xf32>
      %72 = arith.mulf %71, %70 : vector<8x64xf32>
      %cst_40 = arith.constant 1.000000e+00 : f32
      %73 = vector.broadcast %cst_40 : f32 to vector<8x64xf32>
      %74 = arith.addf %73, %72 : vector<8x64xf32>
      %cst_41 = arith.constant 1.000000e+00 : f32
      %75 = vector.broadcast %cst_41 : f32 to vector<8x64xf32>
      %76 = arith.divf %75, %74 : vector<8x64xf32>
      %cst_42 = arith.constant 1.06140542 : f32
      %77 = vector.broadcast %cst_42 : f32 to vector<8x64xf32>
      %78 = arith.mulf %76, %77 : vector<8x64xf32>
      %cst_43 = arith.constant -1.45315206 : f32
      %79 = vector.broadcast %cst_43 : f32 to vector<8x64xf32>
      %80 = arith.addf %79, %78 : vector<8x64xf32>
      %81 = arith.mulf %76, %80 : vector<8x64xf32>
      %cst_44 = arith.constant 1.42141378 : f32
      %82 = vector.broadcast %cst_44 : f32 to vector<8x64xf32>
      %83 = arith.addf %82, %81 : vector<8x64xf32>
      %84 = arith.mulf %76, %83 : vector<8x64xf32>
      %cst_45 = arith.constant -0.284496725 : f32
      %85 = vector.broadcast %cst_45 : f32 to vector<8x64xf32>
      %86 = arith.addf %85, %84 : vector<8x64xf32>
      %87 = arith.mulf %76, %86 : vector<8x64xf32>
      %cst_46 = arith.constant 0.254829586 : f32
      %88 = vector.broadcast %cst_46 : f32 to vector<8x64xf32>
      %89 = arith.addf %88, %87 : vector<8x64xf32>
      %90 = arith.mulf %76, %89 : vector<8x64xf32>
      %cst_47 = arith.constant 0.000000e+00 : f32
      %91 = vector.broadcast %cst_47 : f32 to vector<8x64xf32>
      %92 = arith.subf %91, %70 : vector<8x64xf32>
      %93 = arith.mulf %92, %70 : vector<8x64xf32>
      %94 = math.exp %93 : vector<8x64xf32>
      %95 = arith.mulf %90, %94 : vector<8x64xf32>
      %cst_48 = arith.constant 1.000000e+00 : f32
      %96 = vector.broadcast %cst_48 : f32 to vector<8x64xf32>
      %97 = arith.subf %96, %95 : vector<8x64xf32>
      %cst_49 = arith.constant 0.000000e+00 : f32
      %98 = vector.broadcast %cst_49 : f32 to vector<8x64xf32>
      %99 = arith.cmpf oge, %69, %98 : vector<8x64xf32>
      %cst_50 = arith.constant 0.000000e+00 : f32
      %100 = vector.broadcast %cst_50 : f32 to vector<8x64xf32>
      %101 = arith.subf %100, %97 : vector<8x64xf32>
      %102 = arith.select %99, %97, %101 : vector<8x64xi1>, vector<8x64xf32>
      %cst_51 = arith.constant 1.000000e+00 : f32
      %103 = vector.broadcast %cst_51 : f32 to vector<8x64xf32>
      %104 = arith.addf %103, %102 : vector<8x64xf32>
      %105 = arith.mulf %67, %104 : vector<8x64xf32>
      %106 = arith.truncf %105 : vector<8x64xf32> to vector<8x64xbf16>
      %c0_52 = arith.constant 0 : index
      %c0_53 = arith.constant 0 : index
      %107 = vector.load %arg17[%c0_52, %c0_53] : memref<64x32xbf16, #tpu.memory_space<vmem>>, vector<64x32xbf16>
      %cst_54 = arith.constant dense<0.000000e+00> : vector<8x32xf32>
      %108 = tpu.matmul %106, %107, %cst_54 {dimension_numbers = #tpu.dot_dimension_numbers<[1], [0], [0], [1], [0, 0, 1, 1], [], []>} : vector<8x64xbf16>, vector<64x32xbf16>, vector<8x32xf32> -> vector<8x32xf32>
      %c0_55 = arith.constant 0 : index
      %c0_56 = arith.constant 0 : index
      %109 = vector.load %arg18[%c0_55, %c0_56] : memref<1x32xf32, #tpu.memory_space<vmem>>, vector<1x32xf32>
      %110 = vector.broadcast %109 : vector<1x32xf32> to vector<8x32xf32>
      %111 = arith.addf %108, %110 : vector<8x32xf32>
      %112 = arith.addf %37, %111 : vector<8x32xf32>
      %c0_57 = arith.constant 0 : index
      %c0_58 = arith.constant 0 : index
      %c0_59 = arith.constant 0 : index
      %113 = vector.load %arg19[%c0_57, %c0_58, %c0_59] : memref<1x8x32xf32, #tpu.memory_space<vmem>>, vector<1x8x32xf32>
      %114 = vector.shape_cast %113 : vector<1x8x32xf32> to vector<8x32xf32>
      %115 = vector.shape_cast %112 : vector<8x32xf32> to vector<1x8x32xf32>
      tpu.vector_store %arg19[%c0_57, %c0_58, %c0_59], %115 {strides = array<i32>} : memref<1x8x32xf32, #tpu.memory_space<vmem>>, vector<1x8x32xf32>,
    } else {
    }
    return
  }
  func.func @transform_0(%arg0: i32, %arg1: i32, %arg2: i32) -> (i32, i32, i32) {
    %c0_i32 = arith.constant 0 : i32
    %c0_i32_0 = arith.constant 0 : i32
    return %arg0, %arg1, %c0_i32 : i32, i32, i32
  }
  func.func @transform_1(%arg0: i32, %arg1: i32, %arg2: i32) -> (i32, i32, i32) {
    %c0_i32 = arith.constant 0 : i32
    %c0_i32_0 = arith.constant 0 : i32
    return %arg0, %arg2, %c0_i32 : i32, i32, i32
  }
  func.func @transform_2(%arg0: i32, %arg1: i32, %arg2: i32) -> (i32, i32) {
    %c0_i32 = arith.constant 0 : i32
    %c0_i32_0 = arith.constant 0 : i32
    %c0_i32_1 = arith.constant 0 : i32
    return %c0_i32, %c0_i32_0 : i32, i32
  }
  func.func @transform_3(%arg0: i32, %arg1: i32, %arg2: i32) -> (i32, i32) {
    %c0_i32 = arith.constant 0 : i32
    %c0_i32_0 = arith.constant 0 : i32
    %c0_i32_1 = arith.constant 0 : i32
    return %c0_i32, %c0_i32_0 : i32, i32
  }
  func.func @transform_4(%arg0: i32, %arg1: i32, %arg2: i32) -> (i32, i32) {
    %c0_i32 = arith.constant 0 : i32
    %c0_i32_0 = arith.constant 0 : i32
    %c0_i32_1 = arith.constant 0 : i32
    return %c0_i32, %c0_i32_0 : i32, i32
  }
  func.func @transform_5(%arg0: i32, %arg1: i32, %arg2: i32) -> (i32, i32) {
    %c0_i32 = arith.constant 0 : i32
    %c0_i32_0 = arith.constant 0 : i32
    %c0_i32_1 = arith.constant 0 : i32
    return %c0_i32, %c0_i32_0 : i32, i32
  }
  func.func @transform_6(%arg0: i32, %arg1: i32, %arg2: i32) -> (i32, i32) {
    %c0_i32 = arith.constant 0 : i32
    %c0_i32_0 = arith.constant 0 : i32
    %c0_i32_1 = arith.constant 0 : i32
    return %c0_i32, %c0_i32_0 : i32, i32
  }
  func.func @transform_7(%arg0: i32, %arg1: i32, %arg2: i32) -> (i32, i32) {
    %c0_i32 = arith.constant 0 : i32
    %c0_i32_0 = arith.constant 0 : i32
    %c0_i32_1 = arith.constant 0 : i32
    return %c0_i32, %c0_i32_0 : i32, i32
  }
  func.func @transform_8(%arg0: i32, %arg1: i32, %arg2: i32) -> (i32, i32) {
    %c0_i32 = arith.constant 0 : i32
    %c0_i32_0 = arith.constant 0 : i32
    %c0_i32_1 = arith.constant 0 : i32
    return %c0_i32, %c0_i32_0 : i32, i32
  }
  func.func @transform_9(%arg0: i32, %arg1: i32, %arg2: i32) -> (i32, i32) {
    %c0_i32 = arith.constant 0 : i32
    %c0_i32_0 = arith.constant 0 : i32
    %c0_i32_1 = arith.constant 0 : i32
    return %c0_i32, %c0_i32_0 : i32, i32
  }
  func.func @transform_10(%arg0: i32, %arg1: i32, %arg2: i32) -> (i32, i32) {
    %c0_i32 = arith.constant 0 : i32
    %c0_i32_0 = arith.constant 0 : i32
    %c0_i32_1 = arith.constant 0 : i32
    return %c0_i32, %c0_i32_0 : i32, i32
  }
  func.func @transform_11(%arg0: i32, %arg1: i32, %arg2: i32) -> (i32, i32) {
    %c0_i32 = arith.constant 0 : i32
    %c0_i32_0 = arith.constant 0 : i32
    %c0_i32_1 = arith.constant 0 : i32
    return %c0_i32, %c0_i32_0 : i32, i32
  }
  func.func @transform_12(%arg0: i32, %arg1: i32, %arg2: i32) -> (i32, i32) {
    %c0_i32 = arith.constant 0 : i32
    %c0_i32_0 = arith.constant 0 : i32
    %c0_i32_1 = arith.constant 0 : i32
    return %c0_i32, %c0_i32_0 : i32, i32
  }
  func.func @transform_13(%arg0: i32, %arg1: i32, %arg2: i32) -> (i32, i32) {
    %c0_i32 = arith.constant 0 : i32
    %c0_i32_0 = arith.constant 0 : i32
    %c0_i32_1 = arith.constant 0 : i32
    return %c0_i32, %c0_i32_0 : i32, i32
  }
  func.func @transform_14(%arg0: i32, %arg1: i32, %arg2: i32) -> (i32, i32) {
    %c0_i32 = arith.constant 0 : i32
    %c0_i32_0 = arith.constant 0 : i32
    %c0_i32_1 = arith.constant 0 : i32
    return %c0_i32, %c0_i32_0 : i32, i32
  }
  func.func @transform_15(%arg0: i32, %arg1: i32, %arg2: i32) -> (i32, i32) {
    %c0_i32 = arith.constant 0 : i32
    %c0_i32_0 = arith.constant 0 : i32
    %c0_i32_1 = arith.constant 0 : i32
    return %c0_i32, %c0_i32_0 : i32, i32
  }
  func.func @transform_16(%arg0: i32, %arg1: i32, %arg2: i32) -> (i32, i32, i32) {
    %c0_i32 = arith.constant 0 : i32
    %c0_i32_0 = arith.constant 0 : i32
    return %arg0, %arg1, %c0_i32 : i32, i32, i32
  }
}

</mosaic_0001>

<bundles_post_ra>
// kernel: decoder_forward.9
= control target key start
LH: loop header
LB: loop body
LE: loop exit
PB: predicated region body
PF: predicated region fallthrough
CT: control target
= control target key end

     0   :  { %7 = vsyncpa [#allocation3], 0  ;;  %s729_s0 = inlined_call_operand.hbm [shape: f32[2,8,16], index: 0, kind: input, shape index: {}, may-alias: {0,2}]   ;;  %s730_s1 = inlined_call_operand.vmem [shape: f32[2,8,1], index: 1, kind: input, shape index: {}]   ;;  %s731_s2 = inlined_call_operand.hbm [shape: f32[2,8,16], index: 2, kind: output, shape index: {}, may-alias: {0,2}]  }
   0x1   :  { %9 = vsyncpa [#allocation3 + $0x1], 0 }
   0x2   :  { %10 = vsyncpa [#allocation4], 0 }
   0x3   :  { %12 = vsyncpa [#allocation4 + $0x1], 0  ;;  %s552_s9 = smov 0   ;;  %s554_s10 = smov 0  }
   0x4   :  { %s556_s11 = smov 0   ;;  %s558_s12 = smov 0  }
   0x5   :  { %s560_s13 = smov 0   ;;  %s562_s14 = smov 0  }
   0x6 LB: > { %s342_s15 = sadd.s32 4294967295, %s532_s14   ;;  %s343_s16 = sadd.s32 4294967294, %s532_s14   ;;  %s532_s14 = sphi %s562_s14, %s18_s14   ;;  %s528_s13 = sphi %s560_s13, %s747_s13   ;;  %s524_s12 = sphi %s558_s12, %s746_s12   ;;  %s520_s11 = sphi %s556_s11, %s745_s11   ;;  %s516_s10 = sphi %s554_s10, %s744_s10   ;;  %s512_s9 = sphi %s552_s9, %s743_s9  }
   0x7   : > { %s37_s17 = sadd.s32 1, %s528_s13  ;;  %s48_s18 = sadd.s32 1, %s520_s11 }
   0x8   : > { %p39_p0 = scmp.ge.s32.totalorder %s37_s17, 2  ;;  %p55_p1 = scmp.ne.s32.totalorder %s520_s11, %s516_s10 }
   0x9   : > { %p56_p2 = scmp.eq.s32.totalorder %s532_s14, 0  ;;  %p61_p3 = scmp.ne.s32.totalorder %s516_s10, %s512_s9 }
   0xa   : > { %s749_s17 = smov (%p39_p0, %s37_s17), 0  ;;  %p62_p5 = scmp.eq.s32.totalorder %s342_s15, 0 }
   0xb   : > { %p593_p4 = por %p56_p2, %p55_p1  ;;  %s41_s20 = ssub.s32 %s528_s13, %s749_s17 }
   0xc   : > { %p117_p6 = scmp.eq.s32.totalorder %s342_s15, 1  ;;  %p46_p7 = scmp.eq.s32.totalorder %s41_s20, 0 }
   0xd   : > { %p599_p8 = por %p62_p5, %p61_p3  ;;  %p123_p10 = scmp.eq.s32.totalorder %s343_s16, 1 }
   0xe   : > { %p603_p9 = por %p117_p6, %p55_p1  ;;  %p368_p13 = scmp.lt.s32.totalorder %s532_s14, 2 }
   0xf   : > { %s608_s23 = scalar_select %p46_p7, %s520_s11, %s48_s18  }
  0x10   : > { %s735_s22 = scalar_select %p603_p9, 1, 0 }
  0x11   : > { %p610_p11 = por %p123_p10, %p61_p3  ;;  %s143_s25 = sand.u32 1, %s520_s11  }
  0x12   : > { %s346_s26 = sshll.u32 %s143_s25, 3  ;;  %s347_s27 = sshll.u32 %s528_s13, 7 }
  0x13   : > { %s736_s24 = scalar_select %p610_p11, 1, 0 }
  0x14   : > { %s621_s30 = scalar_lea.hbm %s729_s0, %s347_s27  ;;  %s147_s3 = scalar_lea.vmem [#allocation2], %s346_s26 }
  0x15   : > { %s156_s4 = sshll.u32 %s147_s3, 4  ;;  %p627_p0 = pnand %p368_p13, %p593_p4  ;;  %s623_s4 = int_to_ptr.vmem [resolvable:$true] %s156_s4 }
  0x16   : > { %s144_s6 = scalar_lea.sflag [#allocation3], %s143_s25  ;;  %s420_s7 = scalar_lea.hbm %s621_s30, 128 }
  0x17   : > { %p421_p3 = scmp.ne.s32.totalorder %s621_s30, %s420_s7  ;;  %p422_p5 = pneg %p627_p0 }
  0x18   : > { %s425_s16 = scalar_lea.hbm %s729_s0, 256  ;;  %p426_p4 = scmp.lt.u32.totalorder %s621_s30, %s729_s0 }
  0x19   : > { %p423_p6 = pnand %p422_p5, %p421_p3  ;;  %p427_p10 = scmp.lt.u32.totalorder %s425_s16, %s420_s7 }
  0x1a   : > { %p429_p12 = scmp.lt.u32.totalorder %s420_s7, %s621_s30 }
  0x1b   : > { %p424_p7 = pneg %p423_p6  ;;  %p428_p13 = por %p427_p10, %p426_p4 }
  0x1d   : > { %p430_p1 = por %p429_p12, %p428_p13 }
  0x1f   : > { %p431_p2 = pnand %p430_p1, %p424_p7 }
  0x21   : > { %434 = shalt.err (!%p431_p2)
}
  0x22   : > { %s435_s20 = scalar_lea.vmem %s623_s4, 128  ;;  %s534_s25 = smov [#allocation2]  }
  0x23   : > { %p436_p3 = scmp.ne.s32.totalorder %s623_s4, %s435_s20  ;;  %s440_s26 = sshll.u32 %s534_s25, 4  ;;  %s441_s26 = int_to_ptr.vmem [resolvable:$false] %s440_s26 }
  0x24   : > { %s442_s27 = scalar_lea.vmem %s441_s26, 256  ;;  %p443_p9 = scmp.lt.s32.totalorder %s623_s4, %s441_s26 }
  0x25   : > { %p438_p6 = pnand %p436_p3, %p422_p5  ;;  %p444_p4 = scmp.lt.s32.totalorder %s442_s27, %s435_s20 }
  0x27   : > { %p439_p11 = pneg %p438_p6  ;;  %p445_p10 = por %p444_p4, %p443_p9 }
  0x29   : > { %p446_p12 = pnand %p445_p10, %p439_p11 }
  0x2b   : > { %449 = shalt.err (!%p446_p12)
}
  0x2c   : > { %363 = dma.hbm_to_vmem [thread:$0]  (!%p627_p0), %s621_s30, 128, %s623_s4, %s144_s6  }
  0x2d   : > { %p738_p1 = scmp.lt.s32.totalorder %s532_s14, 3  ;;  %p739_p2 = scmp.ge.s32.totalorder %s532_s14, 1 }
  0x2f   : > { %p172_p5 = pnand %p739_p2, %p738_p1 }
  0x30   : > { %s663_s28 = sand.u32 (!%p172_p5), 1, %s516_s10  }
  0x31   : > { %175 = sbr.rel (%p172_p5) target bundleno = 208 (0xd0), region = 28  ;;  %s349_s29 = sshll.u32 (!%p172_p5), %s663_s28, 3 }
  0x32   : > { %s178_s3 = scalar_lea.sflag (!%p172_p5), [#allocation3], %s663_s28  ;;  %s181_s7 = scalar_lea.vmem (!%p172_p5), [#allocation2], %s349_s29 }
  0x38   : > { %503 = dma.done.wait (%p599_p8), %s178_s3, 128  }
  0x39   : > { %505 = vsyncadd (%p599_p8), %s178_s3, 4294967168  ;;  %p209_p9 = scmp.lt.s32.totalorder %s524_s12, 1  ;;  %v535_v0 = vmov 0   ;;  %v216_v2 = vld [vmem:[%s181_s7] sm:$0xff]  ;;  %s353_s15 = sshll.u32 %s524_s12, 7  ;;  %vm224_vm0 = vcmask 130048  }
  0x3a   : > { %419 = vset.pattern.permute.xlu0 %v535_v0  ;;  %s208_s21 = scalar_lea.vmem [#allocation5], %s349_s29  ;;  %s680_s20 = scalar_lea.hbm %s731_s2, %s353_s15 }
  0x3b   : > { %s210_s30 = scalar_select %p209_p9, %s524_s12, 1 }
  0x3c   : > { %s242_s16 = sshll.u32 %s208_s21, 4  ;;  %s227_s25 = scalar_lea.sflag [#allocation4], %s663_s28  ;;  %s682_s16 = int_to_ptr.vmem [resolvable:$true] %s242_s16 }
  0x3d   : > { %s351_s4 = sshll.u32 %s210_s30, 3  ;;  %s450_s26 = scalar_lea.vmem %s682_s16, 128 }
  0x3e   : > { %s215_s8 = scalar_lea.vmem %s730_s1, %s351_s4  ;;  %p451_p8 = scmp.ne.s32.totalorder %s682_s16, %s450_s26 }
  0x3f   : > { %v217_v1 = vld [vmem:[%s215_s8] sm:$0xff]  ;;  %p740_p11 = scmp.ne.s32.totalorder %s735_s22, 0  ;;  %s536_s12 = smov [#allocation5]  }
  0x40   : > { %220 = vperm.xlu0 %419, %v217_v1   ;;  %s454_s27 = sshll.u32 %s536_s12, 4  ;;  %s455_s27 = int_to_ptr.vmem [resolvable:$false] %s454_s27 }
  0x41   : > { %p452_p0 = pnand %p451_p8, %p740_p11  ;;  %s456_s29 = scalar_lea.vmem %s455_s27, 256 }
  0x42   : > { %p457_p13 = scmp.lt.s32.totalorder %s682_s16, %s455_s27  ;;  %p458_p3 = scmp.lt.s32.totalorder %s456_s29, %s450_s26 }
  0x43   : > { %p453_p7 = pneg %p452_p0 }
  0x44   : > { %p459_p6 = por %p458_p3, %p457_p13 }
  0x46   : > { %p460_p4 = pnand %p459_p6, %p453_p7 }
  0xbf   : > { %v221_v3 = vpop.permute.xlu0 %220 }
  0xc0   : > { %v223_v4 = vsub.f32 %v216_v2, %v221_v3 }
  0xc2   : > { %225 = vst.msk [vmem:[%s208_s21] sm:$0xff] %vm224_vm0, %v223_v4 }
  0xc3   : > { %463 = shalt.err (!%p460_p4)
}
  0xc4   : > { %s464_s28 = scalar_lea.hbm %s680_s20, 128  ;;  %s468_s30 = scalar_lea.hbm %s731_s2, 256 }
  0xc5   : > { %p465_p10 = scmp.ne.s32.totalorder %s680_s20, %s464_s28  ;;  %p469_p2 = scmp.lt.u32.totalorder %s680_s20, %s731_s2 }
  0xc6   : > { %p470_p5 = scmp.lt.u32.totalorder %s468_s30, %s464_s28  ;;  %p472_p8 = scmp.lt.u32.totalorder %s464_s28, %s680_s20 }
  0xc7   : > { %p466_p12 = pnand %p465_p10, %p740_p11 }
  0xc8   : > { %p471_p9 = por %p470_p5, %p469_p2 }
  0xc9   : > { %p467_p1 = pneg %p466_p12 }
  0xca   : > { %p473_p0 = por %p472_p8, %p471_p9 }
  0xcc   : > { %p474_p7 = pnand %p473_p0, %p467_p1 }
  0xce   : > { %477 = shalt.err (!%p474_p7)
}
  0xcf   : > { %358 = dma.vmem_to_hbm [thread:$0]  (%p740_p11), %s682_s16, 128, %s680_s20, %s227_s25  }
  0xd0 PF: > { %s254_s6 = sand.u32 1, %s512_s9   ;;  %p741_p13 = scmp.ne.s32.totalorder %s736_s24, 0 }
  0xd1   : > { %p742_p3 = scmp.ge.s32.totalorder %s532_s14, 2  ;;  %s255_s8 = scalar_lea.sflag [#allocation4], %s254_s6 }
  0xd3   : > { %p365_p6 = pnand %p742_p3, %p741_p13 }
  0xd5   : > { %507 = dma.done.wait (!%p365_p6), %s255_s8, 128  }
  0xd6   : > { %509 = vsyncadd (!%p365_p6), %s255_s8, 4294967168  ;;  %s18_s14 = sadd.s32 1, %s532_s14   ;;  %s743_s9 = smov %s516_s10 }
  0xd7   : > { %p15_p4 = scmp.ge.s32.totalorder %s18_s14, 4   ;;  %s744_s10 = smov %s520_s11 }
  0xd8   : > { %s745_s11 = smov %s608_s23  ;;  %s746_s12 = smov %s528_s13 }
  0xd9   : > { %s747_s13 = smov %s749_s17  ;;  %17 = sbr.rel (!%p15_p4) target bundleno = 6 (0x6), region = 76 }
  0xe0   :  { %260 = vsyncpa [#allocation3], 1 }
  0xe1   :  { %262 = vsyncpa [#allocation3 + $0x1], 1 }
  0xe2   :  { %263 = vsyncpa [#allocation4], 1 }
  0xe3   :  { %265 = vsyncpa [#allocation4 + $0x1], 1 }

// kernel: decoder_forward.8
= control target key start
LH: loop header
LB: loop body
LE: loop exit
PB: predicated region body
PF: predicated region fallthrough
CT: control target
= control target key end

     0   :  { %11 = vsyncpa [#allocation6], 0  ;;  %s935_s0 = inlined_call_operand.vmem [shape: f32[2,8,32], index: 0, kind: input, shape index: {}]   ;;  %s936_s1 = inlined_call_operand.vmem [shape: f32[1,32], index: 1, kind: input, shape index: {}]   ;;  %s937_s2 = inlined_call_operand.vmem [shape: f32[1,32], index: 2, kind: input, shape index: {}]   ;;  %s938_s3 = inlined_call_operand.vmem [shape: bf16[32,16], index: 3, kind: input, shape index: {}]   ;;  %s939_s4 = inlined_call_operand.hbm [shape: f32[2,8,16], index: 4, kind: output, shape index: {0}]   ;;  %s940_s5 = inlined_call_operand.vmem [shape: f32[2,8,1], index: 5, kind: output, shape index: {1}]  }
   0x1   :  { %13 = vsyncpa [#allocation6 + $0x1], 0  ;;  %s792_s18 = smov 0   ;;  %s794_s19 = smov 0  }
   0x2   :  { %s796_s20 = smov 0   ;;  %s798_s21 = smov 0  }
   0x3   :  { %s800_s22 = smov 0   ;;  %s802_s23 = smov 0  }
   0x4 LB: > { %s577_s24 = sadd.s32 4294967295, %s755_s23   ;;  %s578_s25 = sadd.s32 4294967294, %s755_s23   ;;  %s755_s23 = sphi %s802_s23, %s19_s23   ;;  %s751_s22 = sphi %s800_s22, %s947_s22   ;;  %s747_s21 = sphi %s798_s21, %s946_s21   ;;  %s743_s20 = sphi %s796_s20, %s945_s20   ;;  %s739_s19 = sphi %s794_s19, %s944_s19   ;;  %s735_s18 = sphi %s792_s18, %s943_s18  }
   0x5   : > { %s38_s26 = sadd.s32 1, %s751_s22  ;;  %s145_s27 = sadd.s32 1, %s743_s20 }
   0x6   : > { %p40_p0 = scmp.ge.s32.totalorder %s38_s26, 2  ;;  %p155_p1 = scmp.ne.s32.totalorder %s743_s20, %s739_s19 }
   0x7   : > { %p156_p2 = scmp.eq.s32.totalorder %s577_s24, 1  ;;  %p161_p3 = scmp.ne.s32.totalorder %s739_s19, %s735_s18 }
   0x8   : > { %s949_s26 = smov (%p40_p0, %s38_s26), 0  ;;  %p162_p5 = scmp.eq.s32.totalorder %s578_s25, 1 }
   0x9   : > { %p832_p4 = por %p156_p2, %p155_p1  ;;  %s138_s29 = ssub.s32 %s751_s22, %s949_s26 }
   0xa   : > { %p582_p6 = scmp.ge.s32.totalorder %s755_s23, 1  ;;  %p143_p7 = scmp.eq.s32.totalorder %s138_s29, 0 }
   0xb   : > { %p839_p8 = por %p162_p5, %p161_p3  ;;  %p231_p9 = scmp.lt.s32.totalorder %s755_s23, 3 }
   0xc   : > { %s845_s6 = scalar_select %p143_p7, %s743_s20, %s145_s27  }
   0xd   : > { %p232_p10 = pnand %p582_p6, %p231_p9 }
   0xe   : > { %p272_p11 = scmp.lt.s32.totalorder (!%p232_p10), %s747_s21, 1  ;;  %vm298_vm0 = vcmask (!%p232_p10), 261120   ;;  %v667_v7 = vld [vmem:[%s938_s3] sm:$0xff] (!%p232_p10)   ;;  %vm330_vm1 = vcmask (!%p232_p10), 7168   ;;  %v757_v8 = vmov (!%p232_p10), 0.0   ;;  %v668_v9 = vld [vmem:[%s938_s3 + $0x8] sm:$0xff] (!%p232_p10)  }
   0xf   : > { %235 = sbr.rel (%p232_p10) target bundleno = 1019 (0x3fb), region = 36  ;;  %598 = vmatprep.subr.bf16.mxu0 (!%p232_p10), %v757_v8  ;;  %332 = vst.msk [vmem:[#allocation4] sm:$0xff] (!%p232_p10), %vm330_vm1, %v757_v8  ;;  %vm758_vm2 = vmmov (!%p232_p10), 0   ;;  %v586_v14 = vld [vmem:[%s936_s1] ss:$0 sm:$0xff] (!%p232_p10)  ;;  %vm328_vm3 = vcmask (!%p232_p10), 257024  }
  0x10   : > { %599 = vmatpush3.bf16.msra.mxu0 (!%p232_p10), %v667_v7  ;;  %602 = vmatprep.mubr.msk.bf16.mxu0 (!%p232_p10), %vm758_vm2, %v757_v8  ;;  %v587_v16 = vld [vmem:[%s937_s2] ss:$0 sm:$0xff] (!%p232_p10)  ;;  %v759_v21 = vmov (!%p232_p10), -1e+30   ;;  %s260_s27 = sand.u32 (!%p232_p10), 1, %s739_s19   ;;  %vm394_vm4 = vcmask (!%p232_p10), 130048  }
  0x11   : > { %600 = vmatprep.subr.bf16.mxu0 (!%p232_p10), %v757_v8  ;;  %331 = vst.msk [vmem:[#allocation3] sm:$0xff] (!%p232_p10), %vm330_vm1, %v759_v21  ;;  %s583_s29 = sshll.u32 (!%p232_p10), %s260_s27, 3  ;;  %v760_v27 = vmov (!%p232_p10), 0   ;;  %s592_s10 = sshll.u32 (!%p232_p10), %s747_s21, 7 }
  0x12   : > { %s262_s9 = scalar_lea.vmem (!%p232_p10), [#allocation5], %s583_s29  ;;  %665 = vset.pattern.permute.xlu1 (!%p232_p10), %v760_v27  ;;  %666 = vset.pattern.permute.xlu0 (!%p232_p10), %v760_v27  ;;  %s885_s14 = scalar_lea.hbm (!%p232_p10), %s939_s4, %s592_s10 }
  0x13   : > { %s431_s15 = scalar_lea.sflag (!%p232_p10), [#allocation6], %s260_s27  ;;  %s761_s17 = smov (!%p232_p10), [#allocation5]  }
  0x14   : > { %601 = vmatpush3.bf16.msra.mxu0 (!%p232_p10), %v668_v9  ;;  %s681_s24 = sshll.u32 (!%p232_p10), %s761_s17, 4  ;;  %s682_s24 = int_to_ptr.vmem [resolvable:$false] %s681_s24 }
  0x15   : > { %s683_s25 = scalar_lea.vmem (!%p232_p10), %s682_s24, 256 }
  0x16   : > { %s849_s7 = scalar_select %p272_p11, %s747_s21, 1 }
  0x18   : > { %s584_s8 = sshll.u32 %s849_s7, 3  ;;  %v396_v28 = vld [vmem:[#allocation3] sm:$0xff] }
  0x19   : > { %s278_s11 = scalar_lea.vmem %s935_s0, %s584_s8 }
  0x1a   : > { %v295_v0 = vld [vmem:[%s278_s11] sm:$0xff]  ;;  %s453_s11 = sshll.u32 %s262_s9, 4  ;;  %s454_s11 = int_to_ptr.vmem [resolvable:$true] %s453_s11 }
  0x1b   : > { %v299_v1 = vsel %vm298_vm0, %v295_v0, 0.0  ;;  %s677_s16 = scalar_lea.vmem %s454_s11, 128  ;;  %p684_p1 = scmp.lt.s32.totalorder %s454_s11, %s682_s24 }
  0x1c   : > { %300 = vadd.xlane.f32.xlu0 %v299_v1  ;;  %p678_p12 = scmp.ne.s32.totalorder %s454_s11, %s677_s16  ;;  %p685_p2 = scmp.lt.s32.totalorder %s683_s25, %s677_s16 }
  0x1e   : > { %p679_p13 = pnand %p678_p12, %p832_p4  ;;  %p686_p3 = por %p685_p2, %p684_p1 }
  0x20   : > { %p680_p0 = pneg %p679_p13 }
  0x22   : > { %p687_p5 = pnand %p686_p3, %p680_p0 }
  0xa9   : > { %v301_v2 = vpop.xlane.xlu0 %300 }
  0xaa   : > { %v303_v3 = vmul.f32 0.03125, %v301_v2 }
  0xac   : > { %v304_v4 = vsub.f32 %v295_v0, %v303_v3 }
  0xae   : > { %v305_v5 = vmul.f32 %v304_v4, %v304_v4 }
  0xb0   : > { %v306_v6 = vsel %vm298_vm0, %v305_v5, 0.0 }
  0xb1   : > { %307 = vadd.xlane.f32.xlu0 %v306_v6 }
 0x13e   : > { %v308_v10 = vpop.xlane.xlu0 %307 }
 0x13f   : > { %v309_v11 = vmul.f32 0.03125, %v308_v10 }
 0x141   : > { %v310_v12 = vadd.f32 1e-05, %v309_v11 }
 0x143   : > { %669 = vrsqrt.f32 %v310_v12 }
 0x14d   : > { %v670_v13 = vpop.eup %669 }
 0x14e   : > { %v312_v15 = vmul.f32 %v670_v13, %v304_v4 }
 0x150   : > { %v319_v17 = vmul.f32 %v586_v14, %v312_v15 }
 0x152   : > { %v326_v18 = vadd.f32 %v587_v16, %v319_v17 }
 0x154   : > { %v327_v19 = vpack.c.bf16 %v326_v18, %v326_v18 }
 0x156   : > { %329 = vst.msk [vmem:[#allocation2] sm:$0xf] %vm328_vm3, %v327_v19 }
 0x15d   : > { %v333_v20 = vld [vmem:[#allocation2] sm:$0xf] }
 0x15e   : > { %603 = vmatmul.mubr.msk.bf16.vlgmr.msra.gmra.mrb[0].mxu0 %vm298_vm0, %v333_v20 }
 0x231   : > { %v388_v22 = vpop.f32.mrb[0].mxu0 }
 0x232   : > { %v604_v23 = vpop.f32.mrb[1].mxu0  ;;  %v397_v24 = vsel %vm394_vm4, %v388_v22, -inf  ;;  %395 = vst.msk [vmem:[%s262_s9] sm:$0xff] %vm394_vm4, %v388_v22 }
 0x233   : > { %398 = vmax.xlane.f32.xlu1 %v397_v24  ;;  %v391_v25 = vpop.f32.mrb[2].mxu0 }
 0x234   : > { %v605_v26 = vpop.f32.mrb[3].mxu0 }
 0x2c0   : > { %v399_v29 = vpop.xlane.xlu1 %398 }
 0x2c1   : > { %v400_v30 = vmax.f32 %v396_v28, %v399_v29 }
 0x2c3   : > { %v401_v31 = vsub.f32 %v396_v28, %v400_v30  ;;  %420 = vst.msk [vmem:[#allocation3] sm:$0xff] %vm330_vm1, %v400_v30  ;;  %408 = vperm.xlu1 %665, %v400_v30  }
 0x342   : > { %v409_v32 = vpop.permute.xlu1 %408 }
 0x343   : > { %v411_v33 = vsub.f32 %v388_v22, %v409_v32 }
 0x345   : > { %v412_v34 = vmul.f32 1.442695, %v411_v33 }
 0x347   : > { %671 = vpow2.f32 %v412_v34 }
 0x351   : > { %v672_v35 = vpop.eup %671 }
 0x352   : > { %v414_v36 = vsel %vm394_vm4, %v672_v35, 0.0 }
 0x353   : > { %415 = vadd.xlane.f32.xlu0 %v414_v36 }
 0x354   : > { %690 = shalt.err (!%p687_p5)
}
 0x355   : > { %s691_s21 = scalar_lea.hbm %s885_s14, 128  ;;  %s695_s9 = scalar_lea.hbm %s939_s4, 256 }
 0x356   : > { %p692_p6 = scmp.ne.s32.totalorder %s885_s14, %s691_s21  ;;  %p696_p10 = scmp.lt.u32.totalorder %s885_s14, %s939_s4 }
 0x357   : > { %p697_p11 = scmp.lt.u32.totalorder %s695_s9, %s691_s21  ;;  %p699_p13 = scmp.lt.u32.totalorder %s691_s21, %s885_s14 }
 0x358   : > { %p693_p7 = pnand %p692_p6, %p832_p4 }
 0x359   : > { %p698_p12 = por %p697_p11, %p696_p10 }
 0x35a   : > { %p694_p9 = pneg %p693_p7 }
 0x35b   : > { %p700_p0 = por %p699_p13, %p698_p12 }
 0x35d   : > { %p701_p1 = pnand %p700_p0, %p694_p9 }
 0x35f   : > { %704 = shalt.err (!%p701_p1)
}
 0x360   : > { %606 = dma.vmem_to_hbm [thread:$0]  (%p832_p4), %s454_s11, 128, %s885_s14, %s431_s15   ;;  %v402_v37 = vmul.f32 1.442695, %v401_v31  ;;  %v404_v39 = vld [vmem:[#allocation4] sm:$0xff]  ;;  %v424_v46 = vld [vmem:[#allocation3] sm:$0xff] }
 0x361   : > { %s289_s28 = scalar_lea.vmem %s940_s5, %s584_s8 }
 0x362   : > { %673 = vpow2.f32 %v402_v37 }
 0x36c   : > { %v674_v38 = vpop.eup %673 }
 0x36d   : > { %v405_v40 = vmul.f32 %v674_v38, %v404_v39 }
 0x3e0   : > { %v416_v41 = vpop.xlane.xlu0 %415 }
 0x3e1   : > { %v417_v42 = vadd.f32 %v416_v41, %v405_v40 }
 0x3e3   : > { %419 = vst.msk [vmem:[#allocation4] sm:$0xff] %vm330_vm1, %v417_v42 }
 0x3ea   : > { %v425_v43 = vld [vmem:[#allocation4] sm:$0xff] }
 0x3eb   : > { %675 = vlog2.f32 %v425_v43 }
 0x3f5   : > { %v676_v44 = vpop.eup %675 }
 0x3f6   : > { %v427_v45 = vmul.f32 0.6931472, %v676_v44 }
 0x3f8   : > { %v428_v47 = vadd.f32 %v427_v45, %v424_v46 }
 0x3fa   : > { %429 = vst.msk [vmem:[%s289_s28] sm:$0xff] %vm330_vm1, %v428_v47 }
 0x3fb PF: > { %p612_p4 = scmp.ge.s32.totalorder %s755_s23, 2  ;;  %s468_s11 = sand.u32 1, %s735_s18  }
 0x3fc   : > { %s469_s14 = scalar_lea.sflag [#allocation6], %s468_s11 }
 0x3fd   : > { %p609_p2 = pnand %p612_p4, %p839_p8 }
 0x3ff   : > { %730 = dma.done.wait (!%p609_p2), %s469_s14, 128  }
 0x400   : > { %732 = vsyncadd (!%p609_p2), %s469_s14, 4294967168  ;;  %s19_s23 = sadd.s32 1, %s755_s23   ;;  %s943_s18 = smov %s739_s19 }
 0x401   : > { %p16_p3 = scmp.ge.s32.totalorder %s19_s23, 4   ;;  %s944_s19 = smov %s743_s20 }
 0x402   : > { %s945_s20 = smov %s845_s6  ;;  %s946_s21 = smov %s751_s22 }
 0x403   : > { %s947_s22 = smov %s949_s26  ;;  %18 = sbr.rel (!%p16_p3) target bundleno = 4 (0x4), region = 94 }
 0x40a   :  { %484 = vsyncpa [#allocation6], 1 }
 0x40b   :  { %486 = vsyncpa [#allocation6 + $0x1], 1 }

// kernel: decoder_forward.5
= control target key start
LH: loop header
LB: loop body
LE: loop exit
PB: predicated region body
PF: predicated region fallthrough
CT: control target
= control target key end

     0   :  { %s1878_s21 = smov 0   ;;  %s1880_s22 = smov 0   ;;  %s2074_s0 = inlined_call_operand.vmem [shape: f32[2,8,32], index: 0, kind: input, shape index: {}, may-alias: {0,1}]   ;;  %s2075_s1 = inlined_call_operand.vmem [shape: f32[2,8,32], index: 1, kind: input, shape index: {}, may-alias: {0,1}]   ;;  %s2076_s2 = inlined_call_operand.vmem [shape: f32[1,32], index: 2, kind: input, shape index: {}]   ;;  %s2077_s3 = inlined_call_operand.vmem [shape: f32[1,32], index: 3, kind: input, shape index: {}]   ;;  %s2078_s4 = inlined_call_operand.vmem [shape: bf16[32,64], index: 4, kind: input, shape index: {}]   ;;  %s2079_s5 = inlined_call_operand.vmem [shape: f32[1,64], index: 5, kind: input, shape index: {}]   ;;  %s2080_s6 = inlined_call_operand.vmem [shape: bf16[32,128], index: 6, kind: input, shape index: {}]   ;;  %s2081_s7 = inlined_call_operand.vmem [shape: f32[1,128], index: 7, kind: input, shape index: {}]   ;;  %s2082_s8 = inlined_call_operand.vmem [shape: bf16[64,32], index: 8, kind: input, shape index: {}]   ;;  %s2083_s9 = inlined_call_operand.vmem [shape: f32[1,32], index: 9, kind: input, shape index: {}]   ;;  %s2084_s10 = inlined_call_operand.vmem [shape: f32[1,32], index: 10, kind: input, shape index: {}]   ;;  %s2085_s11 = inlined_call_operand.vmem [shape: f32[1,32], index: 11, kind: input, shape index: {}]   ;;  %s2086_s12 = inlined_call_operand.vmem [shape: bf16[32,64], index: 12, kind: input, shape index: {}]   ;;  %s2087_s13 = inlined_call_operand.vmem [shape: f32[1,64], index: 13, kind: input, shape index: {}]   ;;  %s2088_s14 = inlined_call_operand.vmem [shape: bf16[64,32], index: 14, kind: input, shape index: {}]   ;;  %s2089_s15 = inlined_call_operand.vmem [shape: f32[1,32], index: 15, kind: input, shape index: {}]   ;;  %s2090_s16 = inlined_call_operand.vmem [shape: f32[2,8,32], index: 16, kind: output, shape index: {}]  }
   0x1   :  { %2091 = sst [smem:[#allocation6_spill]] %s2074_s0  ;;  %s1882_s23 = smov 0  }
   0x2 LB: > { %s45_s24 = sadd.s32 1, %s1780_s22  ;;  %p1546_p0 = scmp.ge.s32.totalorder %s1784_s23, 1  ;;  %s1784_s23 = sphi %s1882_s23, %s26_s23   ;;  %s1780_s22 = sphi %s1880_s22, %s2094_s22   ;;  %s1776_s21 = sphi %s1878_s21, %s2093_s21  }
   0x3   : > { %p47_p1 = scmp.ge.s32.totalorder %s45_s24, 2  ;;  %p501_p2 = scmp.lt.s32.totalorder %s1784_s23, 3 }
   0x5   : > { %s2096_s24 = smov (%p47_p1, %s45_s24), 0  ;;  %p502_p3 = pnand %p1546_p0, %p501_p2 }
   0x6   : > { %p562_p4 = scmp.lt.s32.totalorder (!%p502_p3), %s1776_s21, 1  ;;  %vm591_vm0 = vcmask (!%p502_p3), 261120   ;;  %s2092_s28 = sld [smem:[#allocation6_spill]] (!%p502_p3)  ;;  %v1725_v14 = vld [vmem:[%s2078_s4] sm:$0xff] (!%p502_p3)   ;;  %v1786_v16 = vmov (!%p502_p3), 0.0   ;;  %v1726_v17 = vld [vmem:[%s2078_s4 + $0x8] sm:$0xff] (!%p502_p3)   ;;  %v803_v59 = vlaneseq (!%p502_p3) }
   0x7   : > { %505 = sbr.rel (%p502_p3) target bundleno = 2488 (0x9b8), region = 84  ;;  %v1727_v15 = vld [vmem:[%s2080_s6] sm:$0xff] (!%p502_p3)   ;;  %1616 = vmatprep.subr.bf16.mxu0 (!%p502_p3), %v1786_v16  ;;  %696 = vst.msk [vmem:[#allocation5] sm:$0xff] (!%p502_p3), %vm591_vm0, %v1786_v16  ;;  %697 = vst.msk [vmem:[#allocation5 + $0x8] sm:$0xff] (!%p502_p3), %vm591_vm0, %v1786_v16  ;;  %1624 = vmatprep.subr.bf16.mxu1 (!%p502_p3), %v1786_v16  ;;  %vm1787_vm1 = vmmov (!%p502_p3), 0   ;;  %v1728_v18 = vld [vmem:[%s2080_s6 + $0x8] sm:$0xff] (!%p502_p3)  }
   0x8   : > { %1617 = vmatpush3.bf16.msra.mxu0 (!%p502_p3), %v1725_v14  ;;  %1625 = vmatpush3.bf16.msra.mxu1 (!%p502_p3), %v1727_v15  ;;  %v1550_v26 = vld [vmem:[%s2076_s2] ss:$0 sm:$0xff] (!%p502_p3)  ;;  %vm689_vm2 = vcmask (!%p502_p3), 519168   ;;  %vm691_vm3 = vcmask (!%p502_p3), 7168   ;;  %v1788_v49 = vmov (!%p502_p3), -1e+30  }
   0x9   : > { %1618 = vmatprep.subr.bf16.mxu0 (!%p502_p3), %v1786_v16  ;;  %1620 = vmatprep.mubr.msk.bf16.mxu0 (!%p502_p3), %vm1787_vm1, %v1786_v16  ;;  %v1551_v28 = vld [vmem:[%s2077_s3] ss:$0 sm:$0xff] (!%p502_p3)  ;;  %692 = vst.msk [vmem:[#allocation3] sm:$0xff] (!%p502_p3), %vm691_vm3, %v1788_v49  ;;  %693 = vst.msk [vmem:[#allocation3 + $0x8] sm:$0xff] (!%p502_p3), %vm691_vm3, %v1788_v49  ;;  %s1789_s27 = smov (!%p502_p3), 96   ;;  %v804_v60 = vshrl.u32 (!%p502_p3), %v803_v59, 7 }
   0xa   : > { %1626 = vmatprep.subr.bf16.mxu1 (!%p502_p3), %v1786_v16  ;;  %1628 = vmatprep.mubr.msk.bf16.mxu1 (!%p502_p3), %vm1787_vm1, %v1786_v16  ;;  %v1552_v37 = vld [vmem:[%s2079_s5] ss:$0 sm:$0xff] (!%p502_p3)  ;;  %694 = vst.msk [vmem:[#allocation4] sm:$0xff] (!%p502_p3), %vm691_vm3, %v1786_v16  ;;  %695 = vst.msk [vmem:[#allocation4 + $0x8] sm:$0xff] (!%p502_p3), %vm691_vm3, %v1786_v16  ;;  %v809_v61 = vand.u32 (!%p502_p3), 127, %v803_v59  ;;  %vm862_vm5 = vcmask (!%p502_p3), 64512  }
   0xb   : > { %v1558_v42 = vld [vmem:[%s2081_s7] ss:$0 sm:$0xff] (!%p502_p3)  ;;  %vm900_vm6 = vcmask (!%p502_p3), 1043456   ;;  %vm1404_vm8 = vcmask (!%p502_p3), 523264  }
   0xc   : > { %1619 = vmatpush3.bf16.msra.mxu0 (!%p502_p3), %v1726_v17  ;;  %1627 = vmatpush3.bf16.msra.mxu1 (!%p502_p3), %v1728_v18  ;;  %vm812_vm4 = vcmp.le.s32.totalorder (!%p502_p3), %v809_v61, %v804_v60 }
   0xd   : > { %1632 = vmatprep.subr.bf16.mxu0 (!%p502_p3), %v1786_v16  ;;  %1638 = vmatprep.subr.bf16.mxu1 (!%p502_p3), %v1786_v16  ;;  %v813_v62 = vsel (!%p502_p3), %vm812_vm4, 0.0, %v1788_v49  ;;  %v1731_v49 = vld [vmem:[%s2082_s8 + $0x8] sm:$0xff] (!%p502_p3)  }
   0xe   : > { %s2098_s21 = smov (!%p562_p4, %s1776_s21), 1 }
   0xf   : > { %s1896_s25 = sshll.u32 %s2098_s21, 3 }
  0x10   : > { %s568_s29 = scalar_lea.vmem %s2092_s28, %s1896_s25  ;;  %s575_s17 = scalar_lea.vmem %s2075_s1, %s1896_s25  ;;  %v1001_v18 = vld [vmem:[#allocation3 + $0x8] sm:$0xff] }
  0x11   : > { %v1902_v0 = vld [vmem:[%s568_s29] sm:$0xff]  ;;  %s1791_s28 = smov 64   ;;  %s1792_s29 = smov 32  }
  0x12   : > { %v592_v1 = vsel %vm591_vm0, %v1902_v0, 0.0  ;;  %v702_v2 = vld [vmem:[%s575_s17] sm:$0xff] }
  0x13   : > { %593 = vadd.xlane.f32.xlu0 %v592_v1  ;;  %v706_v3 = vsel %vm591_vm0, %v702_v2, 0.0 }
  0x17   : > { %707 = vadd.xlane.f32.xlu0 %v706_v3 }
  0xa0   : > { %v594_v4 = vpop.xlane.xlu0 %593 }
  0xa1   : > { %v596_v5 = vmul.f32 0.03125, %v594_v4 }
  0xa3   : > { %v597_v6 = vsub.f32 %v1902_v0, %v596_v5 }
  0xa4   : > { %v708_v7 = vpop.xlane.xlu0 %707 }
  0xa5   : > { %v710_v8 = vmul.f32 0.03125, %v708_v7  ;;  %v598_v9 = vmul.f32 %v597_v6, %v597_v6 }
  0xa7   : > { %v711_v10 = vsub.f32 %v702_v2, %v710_v8  ;;  %v599_v11 = vsel %vm591_vm0, %v598_v9, 0.0 }
  0xa8   : > { %600 = vadd.xlane.f32.xlu1 %v599_v11 }
  0xa9   : > { %v712_v12 = vmul.f32 %v711_v10, %v711_v10 }
  0xab   : > { %v713_v13 = vsel %vm591_vm0, %v712_v12, 0.0 }
  0xac   : > { %714 = vadd.xlane.f32.xlu1 %v713_v13  ;;  %v861_v13 = vld [vmem:[#allocation3] sm:$0xff] }
 0x135   : > { %v601_v19 = vpop.xlane.xlu1 %600 }
 0x136   : > { %v602_v20 = vmul.f32 0.03125, %v601_v19 }
 0x138   : > { %v603_v21 = vadd.f32 1e-05, %v602_v20 }
 0x139   : > { %v715_v22 = vpop.xlane.xlu1 %714 }
 0x13a   : > { %1740 = vrsqrt.f32 %v603_v21  ;;  %v716_v23 = vmul.f32 0.03125, %v715_v22 }
 0x13c   : > { %v717_v24 = vadd.f32 1e-05, %v716_v23 }
 0x13e   : > { %1742 = vrsqrt.f32 %v717_v24 }
 0x144   : > { %v1741_v25 = vpop.eup %1740 }
 0x145   : > { %v605_v27 = vmul.f32 %v1741_v25, %v597_v6  ;;  %v1790_v6 = vmov 0  }
 0x146   : > { %1723 = vset.pattern.permute.xlu0 %v1790_v6  ;;  %1724 = vset.pattern.permute.xlu1 %v1790_v6 }
 0x147   : > { %v612_v29 = vmul.f32 %v1550_v26, %v605_v27 }
 0x148   : > { %v1743_v30 = vpop.eup %1742 }
 0x149   : > { %v619_v31 = vadd.f32 %v1551_v28, %v612_v29  ;;  %v719_v32 = vmul.f32 %v1743_v30, %v711_v10 }
 0x14b   : > { %v620_v33 = vpack.c.bf16 %v619_v31, %v619_v31  ;;  %v726_v34 = vmul.f32 %v1550_v26, %v719_v32 }
 0x14d   : > { %1621 = vmatmul.mubr.msk.bf16.vlgmr.msra.gmra.mrb[0].mxu0 %vm591_vm0, %v620_v33  ;;  %v733_v35 = vadd.f32 %v1551_v28, %v726_v34 }
 0x14e   : > { %1634 = vmatprep.mubr.msk.bf16.mxu0 %vm1787_vm1, %v1786_v16 }
 0x14f   : > { %v734_v36 = vpack.c.bf16 %v733_v35, %v733_v35 }
 0x151   : > { %1629 = vmatmul.mubr.msk.bf16.vlgmr.msra.gmra.mrb[0].mxu1 %vm591_vm0, %v734_v36 }
 0x152   : > { %1640 = vmatprep.mubr.msk.bf16.mxu1 %vm1787_vm1, %v1786_v16 }
 0x220   : > { %v681_v38 = vpop.f32.mrb[0].mxu0 }
 0x221   : > { %v682_v39 = vadd.f32 %v1552_v37, %v681_v38  ;;  %v1622_v40 = vpop.f32.mrb[1].mxu0 }
 0x222   : > { %v684_v41 = vpop.f32.mrb[2].mxu0 }
 0x223   : > { %v687_v43 = vmul.f32 0.17677669, %v682_v39  ;;  %v1623_v44 = vpop.f32.mrb[3].mxu0 }
 0x224   : > { %v795_v45 = vpop.f32.mrb[0].mxu1 }
 0x225   : > { %v688_v46 = vpack.c.bf16 %v687_v43, %v687_v43  ;;  %v796_v47 = vadd.f32 %v1558_v42, %v795_v45  ;;  %v1630_v48 = vpop.f32.mrb[1].mxu1  ;;  %v878_v42 = vld [vmem:[#allocation4] sm:$0xff] }
 0x226   : > { %v798_v50 = vpop.f32.mrb[2].mxu1  ;;  %v1730_v48 = vld [vmem:[%s2082_s8] sm:$0xff]  }
 0x227   : > { %690 = vst.msk [vmem:[#allocation2] sm:$0xf] %vm689_vm2, %v688_v46  ;;  %v814_v51 = vpack.c.bf16 %v796_v47, %v796_v47  ;;  %v1631_v52 = vpop.f32.mrb[3].mxu1  ;;  %v1732_v50 = vld [vmem:[%s2082_s8 + $0x10] sm:$0xff]  }
 0x229   : > { %952 = vrot.lane.b32.xlu0 %v814_v51, %s1789_s27  ;;  %v819_v53 = vsel %vm591_vm0, %v814_v51, 0 }
 0x22a   : > { %1633 = vmatpush3.bf16.xpose.msra.mxu0 %v819_v53 }
 0x22b   : > { %1644 = vmatprep.subr.bf16.mxu0 %v1786_v16 }
 0x22e   : > { %v801_v54 = vld [vmem:[#allocation2] sm:$0xf] }
 0x22f   : > { %v1564_v55 = vcombine.low %v801_v54, %v801_v54 }
 0x231   : > { %950 = vrot.lane.b32.xlu1 %v1564_v55, %s1789_s27  ;;  %1635 = vmatmul.mubr.msk.bf16.vlgmr.msra.gmra.mrb[4].mxu0 %vm591_vm0, %v801_v54 }
 0x232   : > { %1646 = vmatprep.mubr.msk.bf16.mxu0 %vm1787_vm1, %v1786_v16 }
 0x29b   : > { %v953_v56 = vpop.permute.xlu0 %952 }
 0x29c   : > { %v958_v57 = vsel %vm591_vm0, %v953_v56, 0 }
 0x29d   : > { %1645 = vmatpush3.bf16.xpose.msra.mxu0 %v958_v57  ;;  %v1733_v57 = vld [vmem:[%s2082_s8 + $0x18] sm:$0xff]  }
 0x29e   : > { %1656 = vmatprep.subr.bf16.mxu0 %v1786_v16 }
 0x2a3   : > { %v951_v58 = vpop.permute.xlu1 %950 }
 0x2a4   : > { %1647 = vmatmul.mubr.msk.bf16.vlgmr.msra.gmra.mrb[8].mxu0 %vm591_vm0, %v951_v58  ;;  %v886_v58 = vld [vmem:[#allocation5] sm:$0xff] }
 0x2a5   : > { %1660 = vmatprep.mubr.msk.bf16.mxu0 %vm1787_vm1, %v1786_v16  ;;  %1657 = vmatpush3.bf16.msra.mxu0 %v1732_v50  ;;  %v1737_v50 = vld [vmem:[%s2088_s14 + $0x8] sm:$0xff]  }
 0x2a6   : > { %1658 = vmatprep.subr.bf16.mxu0 %v1786_v16 }
 0x2a9   : > { %1659 = vmatpush3.bf16.msra.mxu0 %v1733_v57 }
 0x2aa   : > { %1672 = vmatprep.subr.bf16.mxu0 %v1786_v16 }
 0x304   : > { %v855_v63 = vpop.f32.mrb[4].mxu0 }
 0x305   : > { %v856_v1 = vadd.f32 %v855_v63, %v813_v62  ;;  %v1636_v2 = vpop.f32.mrb[5].mxu0 }
 0x306   : > { %v858_v3 = vpop.f32.mrb[6].mxu0 }
 0x307   : > { %v1637_v4 = vpop.f32.mrb[7].mxu0  ;;  %v863_v5 = vsel %vm862_vm5, %v856_v1, -inf  ;;  %v1026_v3 = vld [vmem:[#allocation5 + $0x8] sm:$0xff] }
 0x308   : > { %864 = vmax.xlane.f32.xlu1 %v863_v5 }
 0x377   : > { %v994_v7 = vpop.f32.mrb[8].mxu0 }
 0x378   : > { %v995_v8 = vadd.f32 %v994_v7, %v813_v62  ;;  %v1648_v9 = vpop.f32.mrb[9].mxu0 }
 0x379   : > { %v997_v10 = vpop.f32.mrb[10].mxu0 }
 0x37a   : > { %v1649_v11 = vpop.f32.mrb[11].mxu0  ;;  %v1002_v12 = vsel %vm862_vm5, %v995_v8, -inf }
 0x37b   : > { %1003 = vmax.xlane.f32.xlu0 %v1002_v12 }
 0x395   : > { %v865_v14 = vpop.xlane.xlu1 %864 }
 0x396   : > { %v866_v15 = vmax.f32 %v861_v13, %v865_v14 }
 0x398   : > { %v867_v17 = vsub.f32 %v861_v13, %v866_v15  ;;  %946 = vst.msk [vmem:[#allocation3] sm:$0xff] %vm691_vm3, %v866_v15  ;;  %872 = vperm.xlu0 %1723, %v866_v15  }
 0x39a   : > { %v868_v27 = vmul.f32 1.442695, %v867_v17 }
 0x408   : > { %v1004_v19 = vpop.xlane.xlu0 %1003 }
 0x409   : > { %v1005_v20 = vmax.f32 %v1001_v18, %v1004_v19 }
 0x40b   : > { %v1006_v21 = vsub.f32 %v1001_v18, %v1005_v20  ;;  %1084 = vst.msk [vmem:[#allocation3 + $0x8] sm:$0xff] %vm691_vm3, %v1005_v20  ;;  %1011 = vperm.xlu1 %1724, %v1005_v20  }
 0x40d   : > { %v1007_v40 = vmul.f32 1.442695, %v1006_v21 }
 0x40f   : > { %895 = vrot.lane.b32.xlu1 %v814_v51, %s1791_s28 }
 0x413   : > { %1034 = vrot.lane.b32.xlu1 %v814_v51, %s1792_s29  ;;  %v1018_v51 = vld [vmem:[#allocation4 + $0x8] sm:$0xff]  ;;  %s582_s29 = scalar_lea.vmem %s2090_s16, %s1896_s25 }
 0x417   : > { %v873_v22 = vpop.permute.xlu0 %872 }
 0x418   : > { %v875_v23 = vsub.f32 %v856_v1, %v873_v22 }
 0x41a   : > { %v876_v24 = vmul.f32 1.442695, %v875_v23 }
 0x41c   : > { %1744 = vpow2.f32 %v876_v24 }
 0x41d   : > { %1746 = vpow2.f32 %v868_v27  ;;  %v1573_v27 = vld [vmem:[%s2083_s9] ss:$0 sm:$0xff] }
 0x426   : > { %v1745_v25 = vpop.eup %1744 }
 0x427   : > { %v880_v26 = vsel %vm862_vm5, %v1745_v25, 0.0  ;;  %v1747_v28 = vpop.eup %1746  ;;  %v893_v34 = vpack.c.bf16 %v1745_v25, %v1745_v25 }
 0x428   : > { %v879_v43 = vmul.f32 %v1747_v28, %v878_v42 }
 0x437   : > { %881 = vadd.xlane.f32.xlu1 %v880_v26 }
 0x448   : > { %889 = vperm.xlu1 %1724, %v1747_v28  }
 0x48a   : > { %v1012_v29 = vpop.permute.xlu1 %1011 }
 0x48b   : > { %v1014_v30 = vsub.f32 %v995_v8, %v1012_v29 }
 0x48d   : > { %v1015_v31 = vmul.f32 1.442695, %v1014_v30 }
 0x48e   : > { %v896_v32 = vpop.permute.xlu1 %895 }
 0x48f   : > { %1748 = vpow2.f32 %v1015_v31  ;;  %v902_v33 = vsel %vm900_vm6, %v896_v32, 0 }
 0x490   : > { %1639 = vmatpush3.bf16.msra.mxu1 %v902_v33  ;;  %1750 = vpow2.f32 %v1007_v40 }
 0x491   : > { %1650 = vmatprep.subr.bf16.mxu1 %v1786_v16 }
 0x492   : > { %v1035_v35 = vpop.permute.xlu1 %1034 }
 0x493   : > { %v1040_v36 = vsel %vm900_vm6, %v1035_v35, 0  ;;  %1641 = vmatmul.mubr.msk.bf16.vlgmr.msra.gmra.mrb[4].mxu1 %vm862_vm5, %v893_v34 }
 0x494   : > { %1651 = vmatpush3.bf16.msra.mxu1 %v1040_v36  ;;  %1652 = vmatprep.mubr.msk.bf16.mxu1 %vm1787_vm1, %v1786_v16 }
 0x495   : > { %1664 = vmatprep.subr.bf16.mxu1 %v1786_v16 }
 0x499   : > { %v1749_v37 = vpop.eup %1748 }
 0x49a   : > { %v1020_v38 = vsel %vm862_vm5, %v1749_v37, 0.0  ;;  %v1033_v39 = vpack.c.bf16 %v1749_v37, %v1749_v37  ;;  %v1751_v41 = vpop.eup %1750 }
 0x49b   : > { %1021 = vadd.xlane.f32.xlu0 %v1020_v38  ;;  %v1019_v52 = vmul.f32 %v1751_v41, %v1018_v51  ;;  %v1734_v38 = vld [vmem:[%s2086_s12] sm:$0xff]   ;;  %v1738_v51 = vld [vmem:[%s2088_s14 + $0x10] sm:$0xff]  }
 0x49c   : > { %1653 = vmatmul.mubr.msk.bf16.vlgmr.msra.gmra.mrb[8].mxu1 %vm862_vm5, %v1033_v39 }
 0x49d   : > { %1668 = vmatprep.mubr.msk.bf16.mxu1 %vm1787_vm1, %v1786_v16  ;;  %1665 = vmatpush3.bf16.msra.mxu1 %v1730_v48 }
 0x49e   : > { %1666 = vmatprep.subr.bf16.mxu1 %v1786_v16 }
 0x4a1   : > { %1667 = vmatpush3.bf16.msra.mxu1 %v1731_v49  ;;  %v1736_v49 = vld [vmem:[%s2088_s14] sm:$0xff]  }
 0x4a2   : > { %1680 = vmatprep.subr.bf16.mxu1 %v1786_v16 }
 0x4b1   : > { %1029 = vperm.xlu0 %1723, %v1751_v41  }
 0x4c4   : > { %v882_v44 = vpop.xlane.xlu1 %881 }
 0x4c5   : > { %v883_v45 = vadd.f32 %v882_v44, %v879_v43  ;;  %v1574_v43 = vld [vmem:[%s2084_s10] ss:$0 sm:$0xff] }
 0x4c7   : > { %885 = vst.msk [vmem:[#allocation4] sm:$0xff] %vm691_vm3, %v883_v45  ;;  %v1575_v45 = vld [vmem:[%s2085_s11] ss:$0 sm:$0xff] }
 0x4c8   : > { %v890_v59 = vpop.permute.xlu1 %889 }
 0x4c9   : > { %v892_v60 = vmul.f32 %v890_v59, %v886_v58 }
 0x4ce   : > { %v1091_v46 = vld [vmem:[#allocation4] sm:$0xff] }
 0x4cf   : > { %1752 = vrcp.f32 %v1091_v46 }
 0x4d9   : > { %v1753_v47 = vpop.eup %1752 }
 0x4da   : > { %1095 = vperm.xlu1 %1724, %v1753_v47  }
 0x528   : > { %v1022_v53 = vpop.xlane.xlu0 %1021 }
 0x529   : > { %v1023_v54 = vadd.f32 %v1022_v53, %v1019_v52  ;;  %v1739_v52 = vld [vmem:[%s2088_s14 + $0x18] sm:$0xff]   ;;  %v1576_v53 = vld [vmem:[%s2087_s13] ss:$0 sm:$0xff] }
 0x52b   : > { %1024 = vst.msk [vmem:[#allocation4 + $0x8] sm:$0xff] %vm691_vm3, %v1023_v54 }
 0x530   : > { %v1030_v4 = vpop.permute.xlu0 %1029 }
 0x531   : > { %v1032_v5 = vmul.f32 %v1030_v4, %v1026_v3 }
 0x532   : > { %v1107_v55 = vld [vmem:[#allocation4 + $0x8] sm:$0xff] }
 0x533   : > { %1754 = vrcp.f32 %v1107_v55 }
 0x53d   : > { %v1755_v56 = vpop.eup %1754 }
 0x53e   : > { %1111 = vperm.xlu1 %1724, %v1755_v56  }
 0x559   : > { %v1096_v7 = vpop.permute.xlu1 %1095 }
 0x566   : > { %v938_v61 = vpop.f32.mrb[4].mxu1 }
 0x567   : > { %v944_v62 = vadd.f32 %v938_v61, %v892_v60  ;;  %v1642_v63 = vpop.f32.mrb[5].mxu1 }
 0x568   : > { %v941_v1 = vpop.f32.mrb[6].mxu1 }
 0x569   : > { %945 = vst.msk [vmem:[#allocation5] sm:$0xff] %vm591_vm0, %v944_v62  ;;  %v1643_v2 = vpop.f32.mrb[7].mxu1 }
 0x56f   : > { %v1076_v6 = vpop.f32.mrb[8].mxu1 }
 0x570   : > { %v1082_v8 = vadd.f32 %v1076_v6, %v1032_v5  ;;  %v1654_v9 = vpop.f32.mrb[9].mxu1  ;;  %v1090_v10 = vld [vmem:[#allocation5] sm:$0xff] }
 0x571   : > { %v1079_v11 = vpop.f32.mrb[10].mxu1  ;;  %v1098_v12 = vmul.f32 %v1096_v7, %v1090_v10 }
 0x572   : > { %1083 = vst.msk [vmem:[#allocation5 + $0x8] sm:$0xff] %vm591_vm0, %v1082_v8  ;;  %v1655_v13 = vpop.f32.mrb[11].mxu1 }
 0x573   : > { %v1099_v14 = vpack.c.bf16 %v1098_v12, %v1098_v12 }
 0x575   : > { %1669 = vmatmul.mubr.msk.bf16.vlgmr.msra.gmra.mrb[12].mxu1 %vm591_vm0, %v1099_v14 }
 0x576   : > { %1688 = vmatprep.mubr.msk.bf16.mxu1 %vm1787_vm1, %v1786_v16  ;;  %1681 = vmatpush3.bf16.msra.mxu1 %v1736_v49 }
 0x577   : > { %1682 = vmatprep.subr.bf16.mxu1 %v1786_v16 }
 0x579   : > { %v1105_v15 = vld [vmem:[#allocation5 + $0x8] sm:$0xff] }
 0x57a   : > { %1683 = vmatpush3.bf16.msra.mxu1 %v1737_v50 }
 0x57b   : > { %1684 = vmatprep.subr.bf16.mxu1 %v1786_v16 }
 0x57e   : > { %1685 = vmatpush3.bf16.msra.mxu1 %v1738_v51 }
 0x57f   : > { %1686 = vmatprep.subr.bf16.mxu1 %v1786_v16 }
 0x582   : > { %1687 = vmatpush3.bf16.msra.mxu1 %v1739_v52 }
 0x5bd   : > { %v1112_v17 = vpop.permute.xlu1 %1111 }
 0x5be   : > { %v1114_v18 = vmul.f32 %v1112_v17, %v1105_v15 }
 0x5c0   : > { %v1115_v19 = vpack.c.bf16 %v1114_v18, %v1114_v18 }
 0x5c2   : > { %1661 = vmatmul.mubr.msk.bf16.vlgmr.msra.gmra.mrb[12].mxu0 %vm591_vm0, %v1115_v19 }
 0x5c3   : > { %1676 = vmatprep.mubr.msk.bf16.mxu0 %vm1787_vm1, %v1786_v16  ;;  %1673 = vmatpush3.bf16.msra.mxu0 %v1734_v38 }
 0x5c4   : > { %1674 = vmatprep.subr.bf16.mxu0 %v1786_v16 }
 0x648   : > { %v1225_v20 = vpop.f32.mrb[12].mxu1 }
 0x649   : > { %v1670_v21 = vpop.f32.mrb[13].mxu1 }
 0x64a   : > { %v1228_v22 = vpop.f32.mrb[14].mxu1 }
 0x64b   : > { %v1671_v23 = vpop.f32.mrb[15].mxu1  ;;  %v1580_v22 = vld [vmem:[%s2089_s15] ss:$0 sm:$0xff] }
 0x695   : > { %v1170_v24 = vpop.f32.mrb[12].mxu0 }
 0x696   : > { %v1226_v25 = vadd.f32 %v1225_v20, %v1170_v24  ;;  %v1662_v26 = vpop.f32.mrb[13].mxu0 }
 0x697   : > { %v1173_v28 = vpop.f32.mrb[14].mxu0 }
 0x698   : > { %v1231_v29 = vadd.f32 %v1226_v25, %v1902_v0  ;;  %v1663_v30 = vpop.f32.mrb[15].mxu0  ;;  %v1735_v0 = vld [vmem:[%s2086_s12 + $0x8] sm:$0xff]  }
 0x699   : > { %1675 = vmatpush3.bf16.msra.mxu0 %v1735_v0 }
 0x69a   : > { %v2018_v31 = vadd.f32 %v1573_v27, %v1231_v29 }
 0x69c   : > { %v1242_v32 = vsel %vm591_vm0, %v2018_v31, 0.0 }
 0x69d   : > { %1243 = vadd.xlane.f32.xlu1 %v1242_v32 }
 0x72a   : > { %v1244_v33 = vpop.xlane.xlu1 %1243 }
 0x72b   : > { %v1246_v34 = vmul.f32 0.03125, %v1244_v33 }
 0x72d   : > { %v1247_v35 = vsub.f32 %v2018_v31, %v1246_v34 }
 0x72f   : > { %v1248_v36 = vmul.f32 %v1247_v35, %v1247_v35 }
 0x731   : > { %v1249_v37 = vsel %vm591_vm0, %v1248_v36, 0.0 }
 0x732   : > { %1250 = vadd.xlane.f32.xlu0 %v1249_v37 }
 0x7bf   : > { %v1251_v39 = vpop.xlane.xlu0 %1250 }
 0x7c0   : > { %v1252_v40 = vmul.f32 0.03125, %v1251_v39 }
 0x7c2   : > { %v1253_v41 = vadd.f32 1e-05, %v1252_v40 }
 0x7c4   : > { %1756 = vrsqrt.f32 %v1253_v41 }
 0x7ce   : > { %v1757_v42 = vpop.eup %1756 }
 0x7cf   : > { %v1255_v44 = vmul.f32 %v1757_v42, %v1247_v35 }
 0x7d1   : > { %v1262_v46 = vmul.f32 %v1574_v43, %v1255_v44 }
 0x7d3   : > { %v1269_v47 = vadd.f32 %v1575_v45, %v1262_v46 }
 0x7d5   : > { %v1270_v48 = vpack.c.bf16 %v1269_v47, %v1269_v47 }
 0x7d7   : > { %1677 = vmatmul.mubr.msk.bf16.vlgmr.msra.gmra.mrb[16].mxu0 %vm591_vm0, %v1270_v48 }
 0x8aa   : > { %v1331_v54 = vpop.f32.mrb[16].mxu0 }
 0x8ab   : > { %v1332_v55 = vadd.f32 %v1576_v53, %v1331_v54  ;;  %v1678_v56 = vpop.f32.mrb[17].mxu0 }
 0x8ac   : > { %v1334_v57 = vpop.f32.mrb[18].mxu0 }
 0x8ad   : > { %v1338_v58 = vmul.f32 0.70710677, %v1332_v55  ;;  %v1679_v59 = vpop.f32.mrb[19].mxu0  ;;  %v1337_v18 = vmul.f32 0.5, %v1332_v55 }
 0x8af   : > { %v1339_v60 = vand.u32 2147483647, %v1338_v58  ;;  %vm1359_vm7 = vcmp.ge.f32.partialorder %v1338_v58, 0.0 }
 0x8b1   : > { %v1340_v61 = vmul.f32 0.3275911, %v1339_v60  ;;  %v1353_v16 = vsub.f32 0.0, %v1339_v60 }
 0x8b3   : > { %v1341_v62 = vadd.f32 1.0, %v1340_v61  ;;  %v1354_v1 = vmul.f32 %v1353_v16, %v1339_v60 }
 0x8b5   : > { %1758 = vrcp.f32 %v1341_v62  ;;  %v1355_v4 = vmul.f32 1.442695, %v1354_v1 }
 0x8b7   : > { %1760 = vpow2.f32 %v1355_v4 }
 0x8bf   : > { %v1759_v63 = vpop.eup %1758 }
 0x8c0   : > { %v1344_v2 = vmul.f32 1.0614054, %v1759_v63 }
 0x8c1   : > { %v1761_v12 = vpop.eup %1760 }
 0x8c2   : > { %v1345_v3 = vadd.f32 -1.4531521, %v1344_v2 }
 0x8c4   : > { %v1346_v5 = vmul.f32 %v1759_v63, %v1345_v3 }
 0x8c6   : > { %v1347_v6 = vadd.f32 1.4214138, %v1346_v5 }
 0x8c8   : > { %v1348_v7 = vmul.f32 %v1759_v63, %v1347_v6 }
 0x8ca   : > { %v1349_v8 = vadd.f32 -0.28449672, %v1348_v7 }
 0x8cc   : > { %v1350_v9 = vmul.f32 %v1759_v63, %v1349_v8 }
 0x8ce   : > { %v1351_v10 = vadd.f32 0.2548296, %v1350_v9 }
 0x8d0   : > { %v1352_v11 = vmul.f32 %v1759_v63, %v1351_v10 }
 0x8d2   : > { %v1357_v13 = vmul.f32 %v1761_v12, %v1352_v11 }
 0x8d4   : > { %v1358_v14 = vsub.f32 1.0, %v1357_v13 }
 0x8d6   : > { %v1360_v15 = vsub.f32 0.0, %v1358_v14 }
 0x8d8   : > { %v1361_v17 = vsel %vm1359_vm7, %v1358_v14, %v1360_v15 }
 0x8d9   : > { %v1362_v19 = vadd.f32 1.0, %v1361_v17 }
 0x8db   : > { %v1363_v20 = vmul.f32 %v1362_v19, %v1337_v18 }
 0x8dd   : > { %v1364_v21 = vpack.c.bf16 %v1363_v20, %v1363_v20 }
 0x8df   : > { %1689 = vmatmul.mubr.msk.bf16.vlgmr.msra.gmra.mrb[16].mxu1 %vm1404_vm8, %v1364_v21 }
 0x9b2   : > { %v1442_v23 = vpop.f32.mrb[16].mxu1 }
 0x9b3   : > { %v1443_v24 = vadd.f32 %v1580_v22, %v1442_v23  ;;  %v1690_v25 = vpop.f32.mrb[17].mxu1 }
 0x9b4   : > { %v1445_v26 = vpop.f32.mrb[18].mxu1 }
 0x9b5   : > { %v1448_v27 = vadd.f32 %v1443_v24, %v2018_v31  ;;  %v1691_v28 = vpop.f32.mrb[19].mxu1 }
 0x9b7   : > { %1449 = vst.msk [vmem:[%s582_s29] sm:$0xff] %vm591_vm0, %v1448_v27 }
 0x9b8 PF: > { %s26_s23 = sadd.s32 1, %s1784_s23   ;;  %s2093_s21 = smov %s1780_s22 }
 0x9b9   : > { %p23_p5 = scmp.ge.s32.totalorder %s26_s23, 4   ;;  %s2094_s22 = smov %s2096_s24 }
 0x9bb   :  { %25 = sbr.rel (!%p23_p5) target bundleno = 2 (0x2), region = 134 }

</bundles_post_ra>
